<compile_context>
chip_gen: v6e
topology: v6e:2x2x1
jax: 0.10.0
libtpu: 0.0.40
codegen_flags: <defaults>
</compile_context>

<pallas_src>
import functools
import numpy as np
import jax
import jax.numpy as jnp
from jax import lax
from jax.experimental import pallas as pl
from jax.experimental.pallas import tpu as pltpu


# ----------------------------------------------------------------------------
# Fused Pallas kernel: re-parameterized kxk conv + bias (+ ReLU) for a Th-row block.
# ----------------------------------------------------------------------------
def _dbb_conv_kernel(*refs, k, Th, Wo, Cin, Cp, use_relu):
    main_ref = refs[0]                 # (1, Th, Wp, Cin) rows of the zero-padded input
    halo_refs = refs[1:k]              # (k-1) x (1, 1, Wp, Cin) halo rows below the block
    w_ref, b_ref, o_ref = refs[k], refs[k + 1], refs[k + 2]

    # Assemble the (Th + k - 1)-row input strip for this output row block.
    if k > 1:
        strip = jnp.concatenate([main_ref[0]] + [h[0] for h in halo_refs], axis=0)
    else:
        strip = main_ref[0]                                         # [Th+k-1, Wp, Cin]

    acc = jnp.zeros((Th * Wo, Cp), jnp.float32)
    # TODO(synk): with tiny Cin one could concatenate the kw taps into the reduction axis
    #             (K = k*Cin, k dots instead of k*k) — skipped because minor-dim concat of
    #             <128-lane operands is not reliably lowered; M = Th*Wo = 128 already gives
    #             a full systolic pass per weight push.
    for kh in range(k):
        rows = strip[kh:kh + Th]                                    # [Th, Wp, Cin]
        for kw in range(k):
            lhs = rows[:, kw:kw + Wo, :].reshape(Th * Wo, Cin)      # [Th*Wo, Cin] bf16
            acc = acc + jnp.dot(lhs, w_ref[kh * k + kw],
                                preferred_element_type=jnp.float32)

    out = acc + b_ref[...]
    if use_relu:
        out = jnp.maximum(out, 0.0)
    o_ref[0, :, :, :] = out.reshape(Th, Wo, Cp).astype(o_ref.dtype)


def _dbb_conv_call(x_pad, w_mat, b_row, *, k, Th, nHb, Wo, Cin, Cp, use_relu, out_dtype):
    N, Hp2, Wp, _ = x_pad.shape
    kernel = functools.partial(_dbb_conv_kernel, k=k, Th=Th, Wo=Wo, Cin=Cin, Cp=Cp,
                               use_relu=use_relu)

    # Main Th-row block (block index == row-block index) + (k-1) single-row halo specs
    # (block size 1 along H -> block index == element row index), all on the same array.
    main_spec = pl.BlockSpec((1, Th, Wp, Cin), lambda n, hb: (n, hb, 0, 0))
    halo_specs = [
        pl.BlockSpec((1, 1, Wp, Cin), lambda n, hb, r=r: (n, hb * Th + Th + r, 0, 0))
        for r in range(k - 1)
    ]
    w_spec = pl.BlockSpec((k * k, Cin, Cp), lambda n, hb: (0, 0, 0))   # resident weights
    b_spec = pl.BlockSpec((1, Cp), lambda n, hb: (0, 0))               # resident bias

    return pl.pallas_call(
        kernel,
        out_shape=jax.ShapeDtypeStruct((N, nHb * Th, Wo, Cp), out_dtype),
        grid=(N, nHb),
        in_specs=[main_spec] + halo_specs + [w_spec, b_spec],
        out_specs=pl.BlockSpec((1, Th, Wo, Cp), lambda n, hb: (n, hb, 0, 0)),
        compiler_params=pltpu.CompilerParams(
            dimension_semantics=("parallel", "parallel")),
    )(*([x_pad] * k + [w_mat, b_row]))


# ----------------------------------------------------------------------------
# Host-side DBB re-parameterization (transI/II/III/V/VI, composed in f32).
# ----------------------------------------------------------------------------
def _fuse_bn(kernel, bn):                                   # transI_fusebn
    t = bn["gamma"] / jnp.sqrt(bn["var"] + bn["eps"])
    return kernel * t[:, None, None, None], bn["beta"] - bn["mean"] * t


def _merge_1x1_kxk(k1, b1, k2, b2, groups):                 # transIII_1x1_kxk
    if groups == 1:
        kk = jnp.einsum("omhw,mi->oihw", k2, k1[:, :, 0, 0])
        b_hat = jnp.einsum("omhw,m->o", k2, b1)
    else:
        k_slices, b_slices = [], []
        g1 = k1.shape[0] // groups
        g2 = k2.shape[0] // groups
        for g in range(groups):
            k1_s = k1[g * g1:(g + 1) * g1, :, 0, 0]
            k2_s = k2[g * g2:(g + 1) * g2]
            k_slices.append(jnp.einsum("omhw,mi->oihw", k2_s, k1_s))
            b_slices.append(jnp.einsum("omhw,m->o", k2_s, b1[g * g1:(g + 1) * g1]))
        kk = jnp.concatenate(k_slices, 0)
        b_hat = jnp.concatenate(b_slices, 0)
    return kk, b_hat + b2


def _avg_kernel(channels, k, groups):                       # transV_avg
    input_dim = channels // groups
    w = np.zeros((channels, input_dim, k, k), np.float32)
    w[np.arange(channels), np.tile(np.arange(input_dim), groups), :, :] = 1.0 / (k * k)
    return jnp.asarray(w)


def identity_1x1(channels, groups):
    input_dim = channels // groups
    idv = np.zeros((channels, input_dim, 1, 1), np.float32)
    for i in range(channels):
        idv[i, i % input_dim, 0, 0] = 1.0
    return jnp.asarray(idv)


def dbb_equivalent_kernel_bias(p, Cin, k, groups):
    Cout = p["w_origin"].shape[0]
    pad = (k - 1) // 2

    k_origin, b_origin = _fuse_bn(p["w_origin"], p["bn_origin"])

    # dbb_1x1 branch -> center tap (transVI_multiscale); requires odd k.
    k_1x1, b_1x1 = _fuse_bn(p["w_1x1"], p["bn_1x1"])
    k_1x1 = jnp.pad(k_1x1, ((0, 0), (0, 0), (pad, pad), (pad, pad)))

    # dbb_1x1_kxk branch: (idconv1x1 + BN&Pad) o (kxk conv + BN).
    k_first = p["w_idconv"] + identity_1x1(Cin, groups)
    k_first, b_first = _fuse_bn(k_first, p["bn1_kxk"])
    k_second, b_second = _fuse_bn(p["w_conv2"], p["bn2_kxk"])
    k_kxk, b_kxk = _merge_1x1_kxk(k_first, b_first, k_second, b_second, groups)

    # dbb_avg branch: (1x1 conv + BN&Pad) o (avgpool as conv) o avgbn.
    k_avg2, b_avg2 = _fuse_bn(_avg_kernel(Cout, k, groups), p["bn_avgbn"])
    k_avg1, b_avg1 = _fuse_bn(p["w_avg_conv"], p["bn_avg_conv"])
    k_avgm, b_avgm = _merge_1x1_kxk(k_avg1, b_avg1, k_avg2, b_avg2, groups)

    # transII_addbranch
    Kw = k_origin + k_1x1 + k_kxk + k_avgm                  # [Cout, Cin//groups, k, k]
    Bv = b_origin + b_1x1 + b_kxk + b_avgm                  # [Cout]
    return Kw, Bv


def kernel_to_mats(Kw, groups, Cp):
    """OIHW [Cout, Cin_g, k, k] -> [k*k, Cin, Cp] bf16 (grouped = block diagonal)."""
    Cout, Cin_g, kh, kw = Kw.shape
    Cin = Cin_g * groups
    co_g = Cout // groups
    dense = jnp.zeros((Cout, Cin, kh, kw), jnp.float32)
    for g in range(groups):
        dense = dense.at[g * co_g:(g + 1) * co_g, g * Cin_g:(g + 1) * Cin_g].set(
            Kw[g * co_g:(g + 1) * co_g])
    w = jnp.transpose(dense, (2, 3, 1, 0)).reshape(kh * kw, Cin, Cout)
    return jnp.pad(w, ((0, 0), (0, 0), (0, Cp - Cout))).astype(jnp.bfloat16)


# ----------------------------------------------------------------------------
# DiverseBranchBlock forward (fused Pallas path)
# ----------------------------------------------------------------------------
def dbb_forward_pallas(x, p, k, stride, groups, act):
    N, Cin, H, W = x.shape
    Cout = p["w_origin"].shape[0]
    assert groups < Cout, "only the groups < out_channels structure is implemented"
    assert stride == 1, "TODO(synk): stride > 1 not supported by the fused Pallas path"
    assert k % 2 == 1, "center-tap merge of the 1x1 branch assumes odd kernel size"
    pad = (k - 1) // 2
    Ho = (H + 2 * pad - k) // stride + 1
    Wo = (W + 2 * pad - k) // stride + 1
    Cp = ((Cout + 127) // 128) * 128           # lane-dense output channel padding
    Th = max(1, min(8, Ho))                    # output rows per grid step (M = Th*Wo)
    nHb = -(-Ho // Th)

    # Exact eval-mode re-parameterization, composed in f32 on the host.
    Kw, Bv = dbb_equivalent_kernel_bias(p, Cin, k, groups)
    w_mat = kernel_to_mats(Kw, groups, Cp)                              # [k*k, Cin, Cp] bf16
    b_row = jnp.pad(Bv.astype(jnp.float32), (0, Cp - Cout)).reshape(1, Cp)

    # Zero-padded NHWC bf16 input (transpose + pad + cast fuse into one XLA op).
    extra_h = nHb * Th - Ho                    # bottom rows so every row block exists
    xh = jnp.transpose(x, (0, 2, 3, 1))
    x_pad = jnp.pad(xh, ((0, 0), (pad, pad + extra_h), (pad, pad), (0, 0))
                    ).astype(jnp.bfloat16)

    out = _dbb_conv_call(x_pad, w_mat, b_row, k=k, Th=Th, nHb=nHb, Wo=Wo,
                         Cin=Cin, Cp=Cp, use_relu=(act is not None),
                         out_dtype=jnp.bfloat16)
    out = out[:, :Ho, :, :Cout]                                # drop row / lane padding
    return jnp.transpose(out, (0, 3, 1, 2)).astype(jnp.float32)   # NHWC -> NCHW


# ----------------------------------------------------------------------------
# Pure-JAX reference (explicit multi-branch forward, for verification only)
# ----------------------------------------------------------------------------
def dbb_reference(x, p, k, stride, groups, act):
    pad = (k - 1) // 2
    Cout = p["w_origin"].shape[0]
    Cin = x.shape[1]

    def conv(x_, w_, s, pd, g):
        return lax.conv_general_dilated(
            x_, w_, (s, s), [(pd, pd), (pd, pd)],
            dimension_numbers=("NCHW", "OIHW", "NCHW"),
            feature_group_count=g, precision=lax.Precision.HIGHEST)

    def bn(x_, b):
        sc = b["gamma"] / jnp.sqrt(b["var"] + b["eps"])
        sh = b["beta"] - b["mean"] * sc
        return x_ * sc[None, :, None, None] + sh[None, :, None, None]

    def bn_bias(b):
        sc = b["gamma"] / jnp.sqrt(b["var"] + b["eps"])
        return b["beta"] - b["mean"] * sc

    y1 = bn(conv(x, p["w_origin"], stride, pad, groups), p["bn_origin"])
    y2 = bn(conv(x, p["w_1x1"], stride, 0, groups), p["bn_1x1"])

    z = bn(conv(x, p["w_avg_conv"], 1, 0, groups), p["bn_avg_conv"])
    pv = bn_bias(p["bn_avg_conv"])[None, :, None, None]
    z_pad = jnp.pad(z - pv, ((0, 0), (0, 0), (pad, pad), (pad, pad))) + pv
    w_pool = jnp.ones((Cout, 1, k, k), jnp.float32) / (k * k)
    za = lax.conv_general_dilated(z_pad, w_pool, (stride, stride), [(0, 0), (0, 0)],
                                  dimension_numbers=("NCHW", "OIHW", "NCHW"),
                                  feature_group_count=Cout,
                                  precision=lax.Precision.HIGHEST)
    y3 = bn(za, p["bn_avgbn"])

    kid = p["w_idconv"] + identity_1x1(Cin, groups)
    u = bn(conv(x, kid, 1, 0, groups), p["bn1_kxk"])
    pv = bn_bias(p["bn1_kxk"])[None, :, None, None]
    u_pad = jnp.pad(u - pv, ((0, 0), (0, 0), (pad, pad), (pad, pad))) + pv
    y4 = bn(conv(u_pad, p["w_conv2"], stride, 0, groups), p["bn2_kxk"])

    out = y1 + y2 + y3 + y4
    return jnp.maximum(out, 0.0) if act is not None else out


# ----------------------------------------------------------------------------
# Deterministic parameter init (synthetic, per module __init__ shapes)
# ----------------------------------------------------------------------------
def init_params(key, Cin, Cout, k, groups, eps=1e-5):
    Cin_g = Cin // groups
    keys = jax.random.split(key, 16)

    def bn_params(kk, C):
        ka, kb, kc, kd = jax.random.split(kk, 4)
        return dict(gamma=jax.random.uniform(ka, (C,), jnp.float32, 0.5, 1.5),
                    beta=jax.random.normal(kb, (C,), jnp.float32) * 0.1,
                    mean=jax.random.normal(kc, (C,), jnp.float32) * 0.1,
                    var=jax.random.uniform(kd, (C,), jnp.float32, 0.5, 1.5),
                    eps=eps)

    return dict(
        w_origin=jax.random.normal(keys[0], (Cout, Cin_g, k, k), jnp.float32) * 0.2,
        bn_origin=bn_params(keys[1], Cout),
        w_1x1=jax.random.normal(keys[2], (Cout, Cin_g, 1, 1), jnp.float32) * 0.2,
        bn_1x1=bn_params(keys[3], Cout),
        w_avg_conv=jax.random.normal(keys[4], (Cout, Cin_g, 1, 1), jnp.float32) * 0.2,
        bn_avg_conv=bn_params(keys[5], Cout),
        bn_avgbn=bn_params(keys[6], Cout),
        w_idconv=jax.random.normal(keys[7], (Cin, Cin_g, 1, 1), jnp.float32) * 0.1,
        bn1_kxk=bn_params(keys[8], Cin),
        w_conv2=jax.random.normal(keys[9], (Cout, Cin_g, k, k), jnp.float32) * 0.2,
        bn2_kxk=bn_params(keys[10], Cout),
    )


# ----------------------------------------------------------------------------
if __name__ == "__main__":
    # DiverseBranchBlock(num_channels=4, num_filters=8, filter_size=3,
    #                    stride=1, groups=1, act='relu', is_repped=False)
    N, Cin, H, W = 2, 4, 16, 16
    Cout, k, stride, groups = 8, 3, 1, 1
    act = "relu"

    key = jax.random.PRNGKey(0)
    kp, kx = jax.random.split(key)
    params = init_params(kp, Cin, Cout, k, groups)
    x = jax.random.normal(kx, (N, Cin, H, W), jnp.float32)

    fwd = jax.jit(functools.partial(dbb_forward_pallas,
                                    k=k, stride=stride, groups=groups, act=act))
    out = jax.block_until_ready(fwd(x, params))

    pad = (k - 1) // 2
    Ho = (H + 2 * pad - k) // stride + 1
    Wo = (W + 2 * pad - k) // stride + 1
    assert out.shape == (N, Cout, Ho, Wo), out.shape

    ref = dbb_reference(x, params, k, stride, groups, act)
    err = float(jnp.max(jnp.abs(out - ref)))
    scale = float(jnp.max(jnp.abs(ref)))
    rel = float(jnp.linalg.norm(out - ref) / (jnp.linalg.norm(ref) + 1e-6))
    # bf16 MXU operands / bf16 output (f32 host-side fold and f32 accumulation).
    assert err <= 3e-2 * scale + 5e-2, (err, scale)
    assert rel <= 2e-2, rel

    print("KERNEL_OK")
</pallas_src>

<mosaic_0001>
module attributes {stable_mosaic.version = 11 : i64} {
  func.func @_dbb_conv_kernel(%arg0: i32, %arg1: i32, %arg2: memref<1x8x18x4xbf16, #tpu.memory_space<vmem>>, %arg3: memref<1x1x18x4xbf16, #tpu.memory_space<vmem>>, %arg4: memref<1x1x18x4xbf16, #tpu.memory_space<vmem>>, %arg5: memref<9x4x128xbf16, #tpu.memory_space<vmem>>, %arg6: memref<1x128xf32, #tpu.memory_space<vmem>>, %arg7: memref<1x8x16x128xbf16, #tpu.memory_space<vmem>>) attributes {dimension_semantics = [#tpu.dimension_semantics<parallel>, #tpu.dimension_semantics<parallel>], iteration_bounds = array<i64: 2, 2>, scalar_prefetch = 0 : i64, scratch_operands = 0 : i64, tpu.core_type = #tpu.core_type<tc>, window_params = [{transform_indices = @transform_0, window_bounds = array<i64: 1, 8, 18, 4>}, {transform_indices = @transform_1, window_bounds = array<i64: 1, 1, 18, 4>}, {transform_indices = @transform_2, window_bounds = array<i64: 1, 1, 18, 4>}, {pipeline_mode = #tpu.pipeline_mode<synchronous>, transform_indices = @transform_3, window_bounds = array<i64: 9, 4, 128>}, {pipeline_mode = #tpu.pipeline_mode<synchronous>, transform_indices = @transform_4, window_bounds = array<i64: 1, 128>}, {transform_indices = @transform_5, window_bounds = array<i64: 1, 8, 16, 128>}]} {
    %c0 = arith.constant 0 : index
    %c0_0 = arith.constant 0 : index
    %c0_1 = arith.constant 0 : index
    %c0_2 = arith.constant 0 : index
    %0 = vector.load %arg2[%c0, %c0_0, %c0_1, %c0_2] : memref<1x8x18x4xbf16, #tpu.memory_space<vmem>>, vector<1x8x18x4xbf16>
    %1 = vector.shape_cast %0 : vector<1x8x18x4xbf16> to vector<8x18x4xbf16>
    %c0_3 = arith.constant 0 : index
    %c0_4 = arith.constant 0 : index
    %c0_5 = arith.constant 0 : index
    %c0_6 = arith.constant 0 : index
    %2 = vector.load %arg3[%c0_3, %c0_4, %c0_5, %c0_6] : memref<1x1x18x4xbf16, #tpu.memory_space<vmem>>, vector<1x1x18x4xbf16>
    %3 = vector.shape_cast %2 : vector<1x1x18x4xbf16> to vector<1x18x4xbf16>
    %c0_7 = arith.constant 0 : index
    %c0_8 = arith.constant 0 : index
    %c0_9 = arith.constant 0 : index
    %c0_10 = arith.constant 0 : index
    %4 = vector.load %arg4[%c0_7, %c0_8, %c0_9, %c0_10] : memref<1x1x18x4xbf16, #tpu.memory_space<vmem>>, vector<1x1x18x4xbf16>
    %5 = vector.shape_cast %4 : vector<1x1x18x4xbf16> to vector<1x18x4xbf16>
    %6 = tpu.concatenate %1, %3, %5 in 0 : vector<8x18x4xbf16>, vector<1x18x4xbf16>, vector<1x18x4xbf16> -> vector<10x18x4xbf16>
    %cst = arith.constant 0.000000e+00 : f32
    %7 = vector.broadcast %cst : f32 to vector<128x128xf32>
    %8 = vector.extract_strided_slice %6 {offsets = [0, 0, 0], sizes = [8, 18, 4], strides = [1, 1, 1]} : vector<10x18x4xbf16> to vector<8x18x4xbf16>
    %9 = vector.extract_strided_slice %8 {offsets = [0, 0, 0], sizes = [8, 16, 4], strides = [1, 1, 1]} : vector<8x18x4xbf16> to vector<8x16x4xbf16>
    %10 = vector.shape_cast %9 : vector<8x16x4xbf16> to vector<128x4xbf16>
    %c0_11 = arith.constant 0 : index
    %c0_12 = arith.constant 0 : index
    %c0_13 = arith.constant 0 : index
    %11 = vector.load %arg5[%c0_11, %c0_12, %c0_13] : memref<9x4x128xbf16, #tpu.memory_space<vmem>>, vector<1x4x128xbf16>
    %12 = vector.shape_cast %11 : vector<1x4x128xbf16> to vector<4x128xbf16>
    %cst_14 = arith.constant dense<0.000000e+00> : vector<128x128xf32>
    %13 = tpu.matmul %10, %12, %cst_14 {dimension_numbers = #tpu.dot_dimension_numbers<[1], [0], [0], [1], [0, 0, 1, 1], [], []>} : vector<128x4xbf16>, vector<4x128xbf16>, vector<128x128xf32> -> vector<128x128xf32>
    %14 = arith.addf %7, %13 : vector<128x128xf32>
    %15 = vector.extract_strided_slice %8 {offsets = [0, 1, 0], sizes = [8, 16, 4], strides = [1, 1, 1]} : vector<8x18x4xbf16> to vector<8x16x4xbf16>
    %16 = vector.shape_cast %15 : vector<8x16x4xbf16> to vector<128x4xbf16>
    %c1 = arith.constant 1 : index
    %c0_15 = arith.constant 0 : index
    %c0_16 = arith.constant 0 : index
    %17 = vector.load %arg5[%c1, %c0_15, %c0_16] : memref<9x4x128xbf16, #tpu.memory_space<vmem>>, vector<1x4x128xbf16>
    %18 = vector.shape_cast %17 : vector<1x4x128xbf16> to vector<4x128xbf16>
    %cst_17 = arith.constant dense<0.000000e+00> : vector<128x128xf32>
    %19 = tpu.matmul %16, %18, %cst_17 {dimension_numbers = #tpu.dot_dimension_numbers<[1], [0], [0], [1], [0, 0, 1, 1], [], []>} : vector<128x4xbf16>, vector<4x128xbf16>, vector<128x128xf32> -> vector<128x128xf32>
    %20 = arith.addf %14, %19 : vector<128x128xf32>
    %21 = vector.extract_strided_slice %8 {offsets = [0, 2, 0], sizes = [8, 16, 4], strides = [1, 1, 1]} : vector<8x18x4xbf16> to vector<8x16x4xbf16>
    %22 = vector.shape_cast %21 : vector<8x16x4xbf16> to vector<128x4xbf16>
    %c2 = arith.constant 2 : index
    %c0_18 = arith.constant 0 : index
    %c0_19 = arith.constant 0 : index
    %23 = vector.load %arg5[%c2, %c0_18, %c0_19] : memref<9x4x128xbf16, #tpu.memory_space<vmem>>, vector<1x4x128xbf16>
    %24 = vector.shape_cast %23 : vector<1x4x128xbf16> to vector<4x128xbf16>
    %cst_20 = arith.constant dense<0.000000e+00> : vector<128x128xf32>
    %25 = tpu.matmul %22, %24, %cst_20 {dimension_numbers = #tpu.dot_dimension_numbers<[1], [0], [0], [1], [0, 0, 1, 1], [], []>} : vector<128x4xbf16>, vector<4x128xbf16>, vector<128x128xf32> -> vector<128x128xf32>
    %26 = arith.addf %20, %25 : vector<128x128xf32>
    %27 = vector.extract_strided_slice %6 {offsets = [1, 0, 0], sizes = [8, 18, 4], strides = [1, 1, 1]} : vector<10x18x4xbf16> to vector<8x18x4xbf16>
    %28 = vector.extract_strided_slice %27 {offsets = [0, 0, 0], sizes = [8, 16, 4], strides = [1, 1, 1]} : vector<8x18x4xbf16> to vector<8x16x4xbf16>
    %29 = vector.shape_cast %28 : vector<8x16x4xbf16> to vector<128x4xbf16>
    %c3 = arith.constant 3 : index
    %c0_21 = arith.constant 0 : index
    %c0_22 = arith.constant 0 : index
    %30 = vector.load %arg5[%c3, %c0_21, %c0_22] : memref<9x4x128xbf16, #tpu.memory_space<vmem>>, vector<1x4x128xbf16>
    %31 = vector.shape_cast %30 : vector<1x4x128xbf16> to vector<4x128xbf16>
    %cst_23 = arith.constant dense<0.000000e+00> : vector<128x128xf32>
    %32 = tpu.matmul %29, %31, %cst_23 {dimension_numbers = #tpu.dot_dimension_numbers<[1], [0], [0], [1], [0, 0, 1, 1], [], []>} : vector<128x4xbf16>, vector<4x128xbf16>, vector<128x128xf32> -> vector<128x128xf32>
    %33 = arith.addf %26, %32 : vector<128x128xf32>
    %34 = vector.extract_strided_slice %27 {offsets = [0, 1, 0], sizes = [8, 16, 4], strides = [1, 1, 1]} : vector<8x18x4xbf16> to vector<8x16x4xbf16>
    %35 = vector.shape_cast %34 : vector<8x16x4xbf16> to vector<128x4xbf16>
    %c4 = arith.constant 4 : index
    %c0_24 = arith.constant 0 : index
    %c0_25 = arith.constant 0 : index
    %36 = vector.load %arg5[%c4, %c0_24, %c0_25] : memref<9x4x128xbf16, #tpu.memory_space<vmem>>, vector<1x4x128xbf16>
    %37 = vector.shape_cast %36 : vector<1x4x128xbf16> to vector<4x128xbf16>
    %cst_26 = arith.constant dense<0.000000e+00> : vector<128x128xf32>
    %38 = tpu.matmul %35, %37, %cst_26 {dimension_numbers = #tpu.dot_dimension_numbers<[1], [0], [0], [1], [0, 0, 1, 1], [], []>} : vector<128x4xbf16>, vector<4x128xbf16>, vector<128x128xf32> -> vector<128x128xf32>
    %39 = arith.addf %33, %38 : vector<128x128xf32>
    %40 = vector.extract_strided_slice %27 {offsets = [0, 2, 0], sizes = [8, 16, 4], strides = [1, 1, 1]} : vector<8x18x4xbf16> to vector<8x16x4xbf16>
    %41 = vector.shape_cast %40 : vector<8x16x4xbf16> to vector<128x4xbf16>
    %c5 = arith.constant 5 : index
    %c0_27 = arith.constant 0 : index
    %c0_28 = arith.constant 0 : index
    %42 = vector.load %arg5[%c5, %c0_27, %c0_28] : memref<9x4x128xbf16, #tpu.memory_space<vmem>>, vector<1x4x128xbf16>
    %43 = vector.shape_cast %42 : vector<1x4x128xbf16> to vector<4x128xbf16>
    %cst_29 = arith.constant dense<0.000000e+00> : vector<128x128xf32>
    %44 = tpu.matmul %41, %43, %cst_29 {dimension_numbers = #tpu.dot_dimension_numbers<[1], [0], [0], [1], [0, 0, 1, 1], [], []>} : vector<128x4xbf16>, vector<4x128xbf16>, vector<128x128xf32> -> vector<128x128xf32>
    %45 = arith.addf %39, %44 : vector<128x128xf32>
    %46 = vector.extract_strided_slice %6 {offsets = [2, 0, 0], sizes = [8, 18, 4], strides = [1, 1, 1]} : vector<10x18x4xbf16> to vector<8x18x4xbf16>
    %47 = vector.extract_strided_slice %46 {offsets = [0, 0, 0], sizes = [8, 16, 4], strides = [1, 1, 1]} : vector<8x18x4xbf16> to vector<8x16x4xbf16>
    %48 = vector.shape_cast %47 : vector<8x16x4xbf16> to vector<128x4xbf16>
    %c6 = arith.constant 6 : index
    %c0_30 = arith.constant 0 : index
    %c0_31 = arith.constant 0 : index
    %49 = vector.load %arg5[%c6, %c0_30, %c0_31] : memref<9x4x128xbf16, #tpu.memory_space<vmem>>, vector<1x4x128xbf16>
    %50 = vector.shape_cast %49 : vector<1x4x128xbf16> to vector<4x128xbf16>
    %cst_32 = arith.constant dense<0.000000e+00> : vector<128x128xf32>
    %51 = tpu.matmul %48, %50, %cst_32 {dimension_numbers = #tpu.dot_dimension_numbers<[1], [0], [0], [1], [0, 0, 1, 1], [], []>} : vector<128x4xbf16>, vector<4x128xbf16>, vector<128x128xf32> -> vector<128x128xf32>
    %52 = arith.addf %45, %51 : vector<128x128xf32>
    %53 = vector.extract_strided_slice %46 {offsets = [0, 1, 0], sizes = [8, 16, 4], strides = [1, 1, 1]} : vector<8x18x4xbf16> to vector<8x16x4xbf16>
    %54 = vector.shape_cast %53 : vector<8x16x4xbf16> to vector<128x4xbf16>
    %c7 = arith.constant 7 : index
    %c0_33 = arith.constant 0 : index
    %c0_34 = arith.constant 0 : index
    %55 = vector.load %arg5[%c7, %c0_33, %c0_34] : memref<9x4x128xbf16, #tpu.memory_space<vmem>>, vector<1x4x128xbf16>
    %56 = vector.shape_cast %55 : vector<1x4x128xbf16> to vector<4x128xbf16>
    %cst_35 = arith.constant dense<0.000000e+00> : vector<128x128xf32>
    %57 = tpu.matmul %54, %56, %cst_35 {dimension_numbers = #tpu.dot_dimension_numbers<[1], [0], [0], [1], [0, 0, 1, 1], [], []>} : vector<128x4xbf16>, vector<4x128xbf16>, vector<128x128xf32> -> vector<128x128xf32>
    %58 = arith.addf %52, %57 : vector<128x128xf32>
    %59 = vector.extract_strided_slice %46 {offsets = [0, 2, 0], sizes = [8, 16, 4], strides = [1, 1, 1]} : vector<8x18x4xbf16> to vector<8x16x4xbf16>
    %60 = vector.shape_cast %59 : vector<8x16x4xbf16> to vector<128x4xbf16>
    %c8 = arith.constant 8 : index
    %c0_36 = arith.constant 0 : index
    %c0_37 = arith.constant 0 : index
    %61 = vector.load %arg5[%c8, %c0_36, %c0_37] : memref<9x4x128xbf16, #tpu.memory_space<vmem>>, vector<1x4x128xbf16>
    %62 = vector.shape_cast %61 : vector<1x4x128xbf16> to vector<4x128xbf16>
    %cst_38 = arith.constant dense<0.000000e+00> : vector<128x128xf32>
    %63 = tpu.matmul %60, %62, %cst_38 {dimension_numbers = #tpu.dot_dimension_numbers<[1], [0], [0], [1], [0, 0, 1, 1], [], []>} : vector<128x4xbf16>, vector<4x128xbf16>, vector<128x128xf32> -> vector<128x128xf32>
    %64 = arith.addf %58, %63 : vector<128x128xf32>
    %c0_39 = arith.constant 0 : index
    %c0_40 = arith.constant 0 : index
    %65 = vector.load %arg6[%c0_39, %c0_40] : memref<1x128xf32, #tpu.memory_space<vmem>>, vector<1x128xf32>
    %66 = vector.broadcast %65 : vector<1x128xf32> to vector<128x128xf32>
    %67 = arith.addf %64, %66 : vector<128x128xf32>
    %cst_41 = arith.constant 0.000000e+00 : f32
    %68 = vector.broadcast %cst_41 : f32 to vector<128x128xf32>
    %69 = arith.maximumf %67, %68 : vector<128x128xf32>
    %70 = vector.shape_cast %69 : vector<128x128xf32> to vector<8x16x128xf32>
    %71 = arith.truncf %70 : vector<8x16x128xf32> to vector<8x16x128xbf16>
    %c0_42 = arith.constant 0 : index
    %c0_43 = arith.constant 0 : index
    %c0_44 = arith.constant 0 : index
    %c0_45 = arith.constant 0 : index
    %72 = vector.load %arg7[%c0_42, %c0_43, %c0_44, %c0_45] : memref<1x8x16x128xbf16, #tpu.memory_space<vmem>>, vector<1x8x16x128xbf16>
    %73 = vector.shape_cast %72 : vector<1x8x16x128xbf16> to vector<8x16x128xbf16>
    %74 = vector.shape_cast %71 : vector<8x16x128xbf16> to vector<1x8x16x128xbf16>
    tpu.vector_store %arg7[%c0_42, %c0_43, %c0_44, %c0_45], %74 {strides = array<i32>} : memref<1x8x16x128xbf16, #tpu.memory_space<vmem>>, vector<1x8x16x128xbf16>,
    return
  }
  func.func @transform_0(%arg0: i32, %arg1: i32) -> (i32, i32, i32, i32) {
    %c0_i32 = arith.constant 0 : i32
    %c0_i32_0 = arith.constant 0 : i32
    %c0_i32_1 = arith.constant 0 : i32
    return %arg0, %arg1, %c0_i32, %c0_i32_0 : i32, i32, i32, i32
  }
  func.func @transform_1(%arg0: i32, %arg1: i32) -> (i32, i32, i32, i32) {
    %c8_i32 = arith.constant 8 : i32
    %0 = arith.muli %arg1, %c8_i32 : i32
    %c8_i32_0 = arith.constant 8 : i32
    %1 = arith.addi %0, %c8_i32_0 : i32
    %c0_i32 = arith.constant 0 : i32
    %2 = arith.addi %1, %c0_i32 : i32
    %c0_i32_1 = arith.constant 0 : i32
    %c0_i32_2 = arith.constant 0 : i32
    %c0_i32_3 = arith.constant 0 : i32
    return %arg0, %2, %c0_i32_1, %c0_i32_2 : i32, i32, i32, i32
  }
  func.func @transform_2(%arg0: i32, %arg1: i32) -> (i32, i32, i32, i32) {
    %c8_i32 = arith.constant 8 : i32
    %0 = arith.muli %arg1, %c8_i32 : i32
    %c8_i32_0 = arith.constant 8 : i32
    %1 = arith.addi %0, %c8_i32_0 : i32
    %c1_i32 = arith.constant 1 : i32
    %2 = arith.addi %1, %c1_i32 : i32
    %c0_i32 = arith.constant 0 : i32
    %c0_i32_1 = arith.constant 0 : i32
    %c0_i32_2 = arith.constant 0 : i32
    return %arg0, %2, %c0_i32, %c0_i32_1 : i32, i32, i32, i32
  }
  func.func @transform_3(%arg0: i32, %arg1: i32) -> (i32, i32, i32) {
    %c0_i32 = arith.constant 0 : i32
    %c0_i32_0 = arith.constant 0 : i32
    %c0_i32_1 = arith.constant 0 : i32
    %c0_i32_2 = arith.constant 0 : i32
    return %c0_i32, %c0_i32_0, %c0_i32_1 : i32, i32, i32
  }
  func.func @transform_4(%arg0: i32, %arg1: i32) -> (i32, i32) {
    %c0_i32 = arith.constant 0 : i32
    %c0_i32_0 = arith.constant 0 : i32
    %c0_i32_1 = arith.constant 0 : i32
    return %c0_i32, %c0_i32_0 : i32, i32
  }
  func.func @transform_5(%arg0: i32, %arg1: i32) -> (i32, i32, i32, i32) {
    %c0_i32 = arith.constant 0 : i32
    %c0_i32_0 = arith.constant 0 : i32
    %c0_i32_1 = arith.constant 0 : i32
    return %arg0, %arg1, %c0_i32, %c0_i32_0 : i32, i32, i32, i32
  }
}

</mosaic_0001>

<bundles_post_ra>
// kernel: dbb_forward_pallas.1
= control target key start
LH: loop header
LB: loop body
LE: loop exit
PB: predicated region body
PF: predicated region fallthrough
CT: control target
= control target key end

     0   :  { %s2838_s18 = smov 0   ;;  %s2840_s19 = smov 0   ;;  %s3706_s0 = inlined_call_operand.vmem [shape: bf16[2,18,18,4], index: 0, kind: input, shape index: {}, may-alias: {0,1,2}]   ;;  %s3707_s1 = inlined_call_operand.vmem [shape: bf16[2,18,18,4], index: 1, kind: input, shape index: {}, may-alias: {0,1,2}]   ;;  %s3708_s2 = inlined_call_operand.vmem [shape: bf16[2,18,18,4], index: 2, kind: input, shape index: {}, may-alias: {0,1,2}]   ;;  %s3709_s3 = inlined_call_operand.vmem [shape: bf16[9,4,128], index: 3, kind: input, shape index: {}]   ;;  %s3710_s4 = inlined_call_operand.vmem [shape: f32[1,128], index: 4, kind: input, shape index: {}]   ;;  %s3711_s5 = inlined_call_operand.vmem [shape: bf16[2,16,16,128], index: 5, kind: output, shape index: {}]  }
   0x1   :  { %s2842_s20 = smov 0   ;;  %s2844_s21 = smov 0  }
   0x2   :  { %s2846_s22 = smov 0  }
   0x3 LB: > { %s24_s23 = sadd.s32 1, %s2798_s20  ;;  %s27_s24 = sadd.s32 1, %s2802_s21  ;;  %s2806_s22 = sphi %s2846_s22, %s15_s22   ;;  %s2802_s21 = sphi %s2844_s21, %s3763_s21   ;;  %s2798_s20 = sphi %s2842_s20, %s3762_s20   ;;  %s2794_s19 = sphi %s2840_s19, %s3761_s19   ;;  %s2790_s18 = sphi %s2838_s18, %s3760_s18  }
   0x4   : > { %p25_p0 = scmp.ge.s32.totalorder %s24_s23, 2  ;;  %p2246_p1 = scmp.ge.s32.totalorder %s2806_s22, 1 }
   0x5   : > { %p267_p2 = scmp.lt.s32.totalorder %s2806_s22, 5 }
   0x6   : > { %s3765_s23 = smov (%p25_p0, %s24_s23), 0  ;;  %s3767_s24 = smov (!%p25_p0, %s27_s24), %s2802_s21 }
   0x7   : > { %p268_p3 = pnand %p2246_p1, %p267_p2  ;;  %p29_p4 = scmp.ge.s32.totalorder %s3767_s24, 2 }
   0x9   : > { %s3769_s24 = smov (%p29_p4, %s3767_s24), 0  ;;  %271 = sbr.rel (%p268_p3) target bundleno = 403 (0x193), region = 40 }
   0xe   : > { %v2257_v0 = vld [vmem:[%s3709_s3 + $0x2] sm:$0x3]  ;;  %vm668_vm0 = vcmask 1041408   ;;  %s2871_s27 = sshll.u32 %s2790_s18, 3  ;;  %p338_p5 = scmp.lt.s32.totalorder %s2794_s19, 1  ;;  %vm643_vm3 = vcmask 31744  }
   0xf   : > { %2705 = vmatprep.subr.msk.bf16.mxu1 %vm668_vm0, %v2257_v0  ;;  %2704 = vmatprep.subr.msk.bf16.mxu0 %vm668_vm0, %v2257_v0  ;;  %v670_v1 = vsel %vm668_vm0, %v2257_v0, 0  ;;  %p340_p6 = scmp.lt.s32.totalorder %s2871_s27, 17  ;;  %v421_v2 = vld [vmem:[%s3709_s3] sm:$0x3]  ;;  %v2298_v3 = vld [vmem:[%s3709_s3 + $0x4] sm:$0x3] }
  0x10   : > { %2703 = vmatpush3.bf16.msra.mxu1 %v670_v1  ;;  %2541 = vmatpush3.bf16.msra.mxu0 %v670_v1  ;;  %s3771_s19 = smov (!%p338_p5, %s2794_s19), 1  ;;  %vm422_vm1 = vsmask.f32 3328  ;;  %vm423_vm2 = vsmask.f32 7440  ;;  %v2921_v15 = vsel %vm668_vm0, %v421_v2, 0 }
  0x11   : > { %s341_s7 = scalar_select %p340_p6, %s2871_s27, 17  ;;  %2706 = vmatprep.subr.msk.bf16.mxu1 %vm668_vm0, %v421_v2  ;;  %2707 = vmatprep.subr.msk.bf16.mxu0 %vm668_vm0, %v2298_v3  ;;  %vm2936_vm4 = vmor %vm422_vm1, %vm423_vm2  ;;  %v2941_v34 = vsel %vm668_vm0, %v2298_v3, 0  ;;  %vm941_vm5 = vcmask 1042432   ;;  %vm942_vm6 = vcmask 1046532  }
  0x12   : > { %s2889_s8 = smul.u32 54, %s3771_s19  ;;  %s354_s17 = sadd.s32 8, %s2871_s27  ;;  %vm3104_vm7 = vmor %vm941_vm5, %vm942_vm6 }
  0x13   : > { %s2714_s9 = smul.u32 3, %s341_s7  ;;  %p3050_p7 = scmp.lt.s32.totalorder %s354_s17, 17 }
  0x14   : > { %s367_s28 = sadd.s32 9, %s2871_s27  ;;  %p382_p9 = scmp.lt.s32.totalorder %s2871_s27, 15 }
  0x15   : > { %s344_s10 = sadd.s32 %s2889_s8, %s2714_s9  ;;  %s3773_s17 = smov (!%p3050_p7, %s354_s17), 17 }
  0x16   : > { %s2248_s11 = sshll.u32 %s344_s10, 2  ;;  %p3097_p8 = scmp.lt.s32.totalorder %s367_s28, 17 }
  0x17   : > { %s2895_s14 = scalar_lea.vmem %s3706_s0, %s2248_s11  ;;  %s2716_s30 = smul.u32 3, %s3773_s17 }
  0x18   : > { %v2898_v4 = vld [vmem:[%s2895_s14] sm:$0xf]  ;;  %v2901_v5 = vld [vmem:[%s2895_s14 + $0x4] sm:$0xf]  ;;  %v2904_v6 = vld [vmem:[%s2895_s14 + $0x8] sm:$0x1] }
  0x19   : > { %v426_v7 = vshrl.u32 %v2898_v4, 16  ;;  %v429_v8 = vshll.u32 %v2898_v4, 16  ;;  %v435_v9 = vshll.u32 %v2901_v5, 16  ;;  %v439_v10 = vshrl.u32 %v2901_v5, 16  ;;  %v2911_v11 = vld [vmem:[%s2895_s14 + $0x30] sm:$0xf]  ;;  %s361_s6 = sadd.s32 %s2716_s30, %s2889_s8 }
  0x1a   : > { %v445_v12 = vshll.u32 %v2904_v6, 16  ;;  %v2915_v13 = vld [vmem:[%s2895_s14 + $0x34] sm:$0xf]  ;;  %v2918_v14 = vld [vmem:[%s2895_s14 + $0x38] sm:$0x1]  ;;  %v522_v21 = vshrl.u32 %v2911_v11, 16 }
  0x1b   : > { %v428_v16 = vrot.slane %v426_v7, 4  ;;  %v431_v17 = vrot.slane %v429_v8, 5  ;;  %v437_v18 = vrot.slane %v435_v9, 5  ;;  %v441_v19 = vrot.slane %v439_v10, 4  ;;  %v2929_v28 = vld [vmem:[%s2895_s14 + $0xc] sm:$0xf] }
  0x1c   : > { %v447_v20 = vrot.slane %v445_v12, 5  ;;  %v525_v22 = vshll.u32 %v2911_v11, 16  ;;  %v531_v23 = vshll.u32 %v2915_v13, 16  ;;  %v535_v26 = vshrl.u32 %v2915_v13, 16  ;;  %v2932_v29 = vld [vmem:[%s2895_s14 + $0x10] sm:$0xf] }
  0x1d   : > { %v432_v24 = vor.u32 %v431_v17, %v428_v16  ;;  %v442_v25 = vor.u32 %v441_v19, %v437_v18  ;;  %v541_v27 = vshll.u32 %v2918_v14, 16  ;;  %v524_v31 = vrot.slane %v522_v21, 4  ;;  %v2944_v40 = vld [vmem:[%s2895_s14 + $0x14] sm:$0x1]  ;;  %v2955_v52 = vld [vmem:[%s2895_s14 + $0x3c] sm:$0xf] }
  0x1e   : > { %v527_v32 = vrot.slane %v525_v22, 5  ;;  %v533_v33 = vrot.slane %v531_v23, 5  ;;  %v537_v37 = vrot.slane %v535_v26, 4  ;;  %v450_v41 = vshrl.u32 %v2929_v28, 16  ;;  %v2959_v57 = vld [vmem:[%s2895_s14 + $0x40] sm:$0xf] }
  0x1f   : > { %v433_v35 = vrot.slane %v432_v24, 4  ;;  %v443_v36 = vrot.slane %v442_v25, 4  ;;  %v543_v38 = vrot.slane %v541_v27, 5  ;;  %v453_v42 = vshll.u32 %v2929_v28, 16  ;;  %v2967_v62 = vld [vmem:[%s2895_s14 + $0x44] sm:$0x1] }
  0x20   : > { %v528_v39 = vor.u32 %v527_v32, %v524_v31  ;;  %v459_v43 = vshll.u32 %v2932_v29, 16  ;;  %v538_v46 = vor.u32 %v537_v37, %v533_v33  ;;  %v463_v47 = vshrl.u32 %v2932_v29, 16  ;;  %v2973_v3 = vld [vmem:[%s2895_s14 + $0x18] sm:$0xf]  ;;  %v2982_v19 = vld [vmem:[%s2895_s14 + $0x1c] sm:$0xf] }
  0x21   : > { %v438_v44 = vsel %vm2936_vm4, %v433_v35, %v437_v18  ;;  %v448_v45 = vsel %vm2936_vm4, %v443_v36, %v447_v20  ;;  %v452_v50 = vrot.slane %v450_v41, 4  ;;  %v455_v51 = vrot.slane %v453_v42, 5  ;;  %v2989_v23 = vld [vmem:[%s2895_s14 + $0x20] sm:$0x1]  ;;  %v2996_v32 = vld [vmem:[%s2895_s14 + $0x48] sm:$0xf] }
  0x22   : > { %v2258_v48 = vcombine.low %v438_v44, %v448_v45  ;;  %v529_v49 = vrot.slane %v528_v39, 4  ;;  %v539_v53 = vrot.slane %v538_v46, 4  ;;  %v461_v54 = vrot.slane %v459_v43, 5  ;;  %v3009_v44 = vld [vmem:[%s2895_s14 + $0x4c] sm:$0xf]  ;;  %s3775_s28 = smov (!%p3097_p8, %s367_s28), 17 }
  0x23   : > { %v465_v55 = vrot.slane %v463_v47, 4  ;;  %v469_v56 = vshll.u32 %v2944_v40, 16  ;;  %v949_v58 = vrot.slane %v2904_v6, 5  ;;  %v456_v60 = vor.u32 %v455_v51, %v452_v50  ;;  %s2717_s7 = smul.u32 3, %s3775_s28  ;;  %s2250_s9 = sshll.u32 %s361_s6, 2 }
  0x24   : > { %2542 = vmatprep.mubr.msk.bf16.mxu0 %vm643_vm3, %v2258_v48  ;;  %v534_v59 = vsel %vm2936_vm4, %v529_v49, %v533_v33  ;;  %v953_v61 = vrot.slane %v2932_v29, 5  ;;  %v544_v63 = vsel %vm2936_vm4, %v539_v53, %v543_v38  ;;  %v546_v2 = vshrl.u32 %v2955_v52, 16  ;;  %v3004_v38 = vld [vmem:[%s3709_s3 + $0x8] sm:$0x3]  ;;  %s363_s12 = scalar_lea.vmem %s3707_s1, %s2250_s9  ;;  %s3777_s27 = smov (!%p382_p9, %s2871_s27), 15 }
  0x25   : > { %v466_v0 = vor.u32 %v465_v55, %v461_v54  ;;  %v471_v1 = vrot.slane %v469_v56, 5  ;;  %v2975_v7 = vcombine.low %v534_v59, %v544_v63  ;;  %v457_v8 = vrot.slane %v456_v60, 4  ;;  %v3023_v63 = vld [vmem:[%s2895_s14 + $0x24] sm:$0xf]  ;;  %s3182_s13 = sadd.s32 %s2717_s7, %s2889_s8  ;;  %s2254_s7 = sshll.u32 %s3777_s27, 1 }
  0x26   : > { %v549_v9 = vshll.u32 %v2955_v52, 16  ;;  %v555_v10 = vshll.u32 %v2959_v57, 16  ;;  %v548_v16 = vrot.slane %v546_v2, 4  ;;  %v559_v17 = vshrl.u32 %v2959_v57, 16  ;;  %s2252_s8 = sshll.u32 %s3182_s13, 2  ;;  %s2255_s9 = sshll.u32 %s3771_s19, 5 }
  0x27   : > { %v467_v12 = vrot.slane %v466_v0, 4  ;;  %v565_v18 = vshll.u32 %v2967_v62, 16  ;;  %2550 = vmatprep.mubr.msk.bf16.mxu1 %vm643_vm3, %v2975_v7  ;;  %v462_v20 = vsel %vm2936_vm4, %v457_v8, %v461_v54  ;;  %v474_v24 = vshrl.u32 %v2973_v3, 16  ;;  %v3017_v54 = vld [vmem:[%s2895_s14 + $0x50] sm:$0x1]  ;;  %s376_s26 = scalar_lea.vmem %s3708_s2, %s2252_s8  ;;  %s3620_s19 = sadd.s32 %s2255_s9, %s2254_s7 }
  0x28   : > { %v551_v21 = vrot.slane %v549_v9, 5  ;;  %v557_v22 = vrot.slane %v555_v10, 5  ;;  %v561_v26 = vrot.slane %v559_v17, 4  ;;  %v477_v31 = vshll.u32 %v2973_v3, 16  ;;  %v3032_v8 = vld [vmem:[%s2895_s14 + $0x28] sm:$0xf] }
  0x29   : > { %v472_v25 = vsel %vm2936_vm4, %v467_v12, %v471_v1  ;;  %v567_v27 = vrot.slane %v565_v18, 5  ;;  %v476_v36 = vrot.slane %v474_v24, 4  ;;  %v483_v37 = vshll.u32 %v2982_v19, 16  ;;  %v3040_v17 = vld [vmem:[%s3709_s3 + $0x6] sm:$0x3]  ;;  %s2256_s27 = sshll.u32 %s3620_s19, 2 }
  0x2a   : > { %v2998_v33 = vcombine.low %v462_v20, %v472_v25  ;;  %v552_v35 = vor.u32 %v551_v21, %v548_v16  ;;  %v562_v39 = vor.u32 %v561_v26, %v557_v22  ;;  %v479_v41 = vrot.slane %v477_v31, 5 }
  0x2b   : > { %v487_v42 = vshrl.u32 %v2982_v19, 16  ;;  %v493_v43 = vshll.u32 %v2989_v23, 16  ;;  %v485_v46 = vrot.slane %v483_v37, 5  ;;  %v570_v47 = vshrl.u32 %v2996_v32, 16 }
  0x2c   : > { %2543 = vmatmul.mubr.msk.bf16.vlgmr.msra.gmra.mxu0 %vm643_vm3, %v2998_v33  ;;  %v553_v45 = vrot.slane %v552_v35, 4  ;;  %v573_v48 = vshll.u32 %v2996_v32, 16  ;;  %v563_v49 = vrot.slane %v562_v39, 4  ;;  %v480_v50 = vor.u32 %v479_v41, %v476_v36  ;;  %v3059_v35 = vld [vmem:[%s2895_s14 + $0x54] sm:$0xf] }
  0x2d   : > { %2577 = vmatpush3.bf16.msra.mxu0 %v2941_v34  ;;  %v489_v51 = vrot.slane %v487_v42, 4  ;;  %v495_v53 = vrot.slane %v493_v43, 5  ;;  %v572_v56 = vrot.slane %v570_v47, 4  ;;  %v579_v60 = vshll.u32 %v3009_v44, 16  ;;  %v3066_v42 = vld [vmem:[%s2895_s14 + $0x58] sm:$0xf] }
  0x2e   : > { %v558_v55 = vsel %vm2936_vm4, %v553_v45, %v557_v22  ;;  %v575_v59 = vrot.slane %v573_v48, 5  ;;  %2709 = vmatprep.subr.msk.bf16.mxu0 %vm668_vm0, %v3004_v38  ;;  %v568_v34 = vsel %vm2936_vm4, %v563_v49, %v567_v27  ;;  %v481_v0 = vrot.slane %v480_v50, 4  ;;  %v3045_v22 = vld [vmem:[%s2895_s14 + $0x2c] sm:$0x1] }
  0x2f   : > { %v490_v1 = vor.u32 %v489_v51, %v485_v46  ;;  %v583_v2 = vshrl.u32 %v3009_v44, 16  ;;  %v3034_v9 = vcombine.low %v558_v55, %v568_v34  ;;  %v581_v12 = vrot.slane %v579_v60, 5 }
  0x30   : > { %v576_v10 = vor.u32 %v575_v59, %v572_v56  ;;  %v589_v16 = vshll.u32 %v3017_v54, 16  ;;  %v486_v18 = vsel %vm2936_vm4, %v481_v0, %v485_v46  ;;  %v498_v24 = vshrl.u32 %v3023_v63, 16 }
  0x31   : > { %v491_v20 = vrot.slane %v490_v1, 4  ;;  %v585_v21 = vrot.slane %v583_v2, 4  ;;  %2551 = vmatmul.mubr.msk.bf16.vlgmr.msra.gmra.mxu1 %vm643_vm3, %v3034_v9  ;;  %v501_v27 = vshll.u32 %v3023_v63, 16  ;;  %v507_v31 = vshll.u32 %v3032_v8, 16 }
  0x32   : > { %v577_v25 = vrot.slane %v576_v10, 4  ;;  %v591_v26 = vrot.slane %v589_v16, 5  ;;  %2559 = vmatpush3.bf16.msra.mxu1 %v2921_v15  ;;  %v500_v39 = vrot.slane %v498_v24, 4  ;;  %v511_v41 = vshrl.u32 %v3032_v8, 16  ;;  %v2367_v24 = vld [vmem:[%s3709_s3 + $0x10] sm:$0x3] }
  0x33   : > { %v496_v36 = vsel %vm2936_vm4, %v491_v20, %v495_v53  ;;  %v586_v37 = vor.u32 %v585_v21, %v581_v12  ;;  %v503_v46 = vrot.slane %v501_v27, 5  ;;  %v509_v47 = vrot.slane %v507_v31, 5  ;;  %2708 = vmatprep.subr.msk.bf16.mxu1 %vm668_vm0, %v3040_v17  ;;  %v3080_v53 = vld [vmem:[%s2895_s14 + $0x5c] sm:$0x1]  ;;  %s3644_s14 = scalar_lea.vmem %s3711_s5, %s2256_s27 }
  0x34   : > { %v3068_v43 = vcombine.low %v486_v18, %v496_v36  ;;  %v582_v45 = vsel %vm2936_vm4, %v577_v25, %v581_v12  ;;  %v513_v48 = vrot.slane %v511_v41, 4  ;;  %v517_v49 = vshll.u32 %v3045_v22, 16 }
  0x35   : > { %v587_v15 = vrot.slane %v586_v37, 4  ;;  %v594_v50 = vshrl.u32 %v3059_v35, 16  ;;  %v504_v51 = vor.u32 %v503_v46, %v500_v39  ;;  %v597_v55 = vshll.u32 %v3059_v35, 16 }
  0x36   : > { %2546 = vmatprep.mubr.msk.bf16.mxu0 %vm643_vm3, %v3068_v43  ;;  %v603_v56 = vshll.u32 %v3066_v42, 16  ;;  %v607_v59 = vshrl.u32 %v3066_v42, 16  ;;  %v514_v34 = vor.u32 %v513_v48, %v509_v47  ;;  %v519_v0 = vrot.slane %v517_v49, 5 }
  0x37   : > { %v592_v60 = vsel %vm2936_vm4, %v587_v15, %v591_v26  ;;  %v596_v1 = vrot.slane %v594_v50, 4  ;;  %v505_v10 = vrot.slane %v504_v51, 4  ;;  %v599_v12 = vrot.slane %v597_v55, 5 }
  0x38   : > { %v3093_v2 = vcombine.low %v582_v45, %v592_v60  ;;  %v605_v16 = vrot.slane %v603_v56, 5  ;;  %v515_v18 = vrot.slane %v514_v34, 4  ;;  %v609_v20 = vrot.slane %v607_v59, 4 }
  0x39   : > { %v613_v21 = vshll.u32 %v3080_v53, 16  ;;  %v2290_v25 = vrot.slane %v2898_v4, 9  ;;  %v956_v26 = vrot.slane %v2944_v40, 5  ;;  %v510_v27 = vsel %vm2936_vm4, %v505_v10, %v509_v47 }
  0x3a   : > { %2554 = vmatprep.mubr.msk.bf16.mxu1 %vm643_vm3, %v3093_v2  ;;  %v600_v31 = vor.u32 %v599_v12, %v596_v1  ;;  %v946_v36 = vrot.slane %v2901_v5, 5  ;;  %v520_v37 = vsel %vm2936_vm4, %v515_v18, %v519_v0  ;;  %v610_v39 = vor.u32 %v609_v20, %v605_v16 }
  0x3b   : > { %v615_v41 = vrot.slane %v613_v21, 5  ;;  %v2291_v45 = vrot.slane %v2929_v28, 9  ;;  %v3119_v46 = vcombine.low %v510_v27, %v520_v37  ;;  %v2274_v49 = vcombine.low %v2898_v4, %v2901_v5 }
  0x3c   : > { %v601_v40 = vrot.slane %v600_v31, 4  ;;  %v947_v15 = vsel %vm3104_vm7, %v2290_v25, %v946_v36  ;;  %v948_v48 = vrot.slane %v946_v36, 4  ;;  %v611_v47 = vrot.slane %v610_v39, 4 }
  0x3d   : > { %v954_v50 = vsel %vm3104_vm7, %v2291_v45, %v953_v61  ;;  %v955_v51 = vrot.slane %v953_v61, 4  ;;  %2547 = vmatmul.mubr.msk.bf16.gmra.mxu0 %vm643_vm3, %v3119_v46  ;;  %v2292_v5 = vrot.slane %v2973_v3, 9  ;;  %v960_v56 = vrot.slane %v2982_v19, 5 }
  0x3e   : > { %v606_v55 = vsel %vm2936_vm4, %v601_v40, %v605_v16  ;;  %v950_v4 = vsel %vm3104_vm7, %v948_v48, %v949_v58  ;;  %v616_v59 = vsel %vm2936_vm4, %v611_v47, %v615_v41  ;;  %v963_v34 = vrot.slane %v2989_v23, 5  ;;  %v3196_v41 = vld [vmem:[%s3709_s3 + $0xc] sm:$0x3] }
  0x3f   : > { %v2299_v61 = vcombine.low %v947_v15, %v950_v4  ;;  %v957_v60 = vsel %vm3104_vm7, %v955_v51, %v956_v26  ;;  %v3153_v0 = vcombine.low %v606_v55, %v616_v59  ;;  %v961_v6 = vsel %vm3104_vm7, %v2292_v5, %v960_v56  ;;  %v417_v51 = vld [vmem:[%s363_s12 + $0x8] sm:$0x1] }
  0x40   : > { %v962_v58 = vrot.slane %v960_v56, 4  ;;  %v977_v1 = vrot.slane %v2918_v14, 5  ;;  %v2293_v10 = vrot.slane %v3023_v63, 9  ;;  %v967_v12 = vrot.slane %v3032_v8, 5 }
  0x41   : > { %2578 = vmatprep.mubr.msk.bf16.mxu0 %vm643_vm3, %v2299_v61  ;;  %v970_v16 = vrot.slane %v3045_v22, 5  ;;  %2555 = vmatmul.mubr.msk.bf16.gmra.mxu1 %vm643_vm3, %v3153_v0  ;;  %v3165_v23 = vcombine.low %v954_v50, %v957_v60  ;;  %v2294_v14 = vrot.slane %v2911_v11, 9  ;;  %v974_v20 = vrot.slane %v2915_v13, 5 }
  0x42   : > { %v964_v18 = vsel %vm3104_vm7, %v962_v58, %v963_v34  ;;  %2560 = vmatprep.mubr.msk.bf16.mxu1 %vm643_vm3, %v2274_v49  ;;  %v969_v25 = vrot.slane %v967_v12, 4  ;;  %v1325_v22 = vsel %vm668_vm0, %v3004_v38, 0  ;;  %v2295_v27 = vrot.slane %v2955_v52, 9  ;;  %v3215_v49 = vld [vmem:[%s363_s12] sm:$0xf] }
  0x43   : > { %v3172_v21 = vcombine.low %v961_v6, %v964_v18  ;;  %v976_v26 = vrot.slane %v974_v20, 4  ;;  %v981_v31 = vrot.slane %v2959_v57, 5  ;;  %v3186_v36 = vcombine.low %v2929_v28, %v2932_v29 }
  0x44   : > { %v968_v37 = vsel %vm3104_vm7, %v2293_v10, %v967_v12  ;;  %v971_v38 = vsel %vm3104_vm7, %v969_v25, %v970_v16  ;;  %v984_v39 = vrot.slane %v2967_v62, 5  ;;  %v975_v28 = vsel %vm3104_vm7, %v2294_v14, %v974_v20  ;;  %v3269_v25 = vld [vmem:[%s376_s26] sm:$0xf] }
  0x45   : > { %2579 = vmatmul.mubr.msk.bf16.vlgmr.msra.gmra.mxu0 %vm643_vm3, %v3165_v23  ;;  %v978_v29 = vsel %vm3104_vm7, %v976_v26, %v977_v1  ;;  %v983_v45 = vrot.slane %v981_v31, 4  ;;  %v2296_v40 = vrot.slane %v2996_v32, 9  ;;  %v1177_v62 = vsel %vm668_vm0, %v3040_v17, 0 }
  0x46   : > { %2613 = vmatpush3.bf16.msra.mxu0 %v1325_v22  ;;  %v3209_v15 = vcombine.low %v2973_v3, %v2982_v19  ;;  %2582 = vmatprep.mubr.msk.bf16.mxu0 %vm643_vm3, %v3172_v21  ;;  %v988_v48 = vrot.slane %v3009_v44, 5  ;;  %v991_v47 = vrot.slane %v3017_v54, 5  ;;  %v3220_v50 = vcombine.low %v3023_v63, %v3032_v8  ;;  %v3232_v54 = vld [vmem:[%s363_s12 + $0x4] sm:$0xf] }
  0x47   : > { %v3222_v17 = vcombine.low %v968_v37, %v971_v38  ;;  %v3226_v3 = vcombine.low %v2911_v11, %v2915_v13  ;;  %v982_v19 = vsel %vm3104_vm7, %v2295_v27, %v981_v31  ;;  %2711 = vmatprep.subr.msk.bf16.mxu0 %vm668_vm0, %v3196_v41  ;;  %v3234_v55 = vcombine.low %v975_v28, %v978_v29  ;;  %v3242_v11 = vld [vmem:[%s3709_s3 + $0xa] sm:$0x3]  ;;  %v3275_v31 = vld [vmem:[%s376_s26 + $0x4] sm:$0xf]  ;;  %v420_v29 = vld [vmem:[%s376_s26 + $0x8] sm:$0x1] }
  0x48   : > { %v985_v63 = vsel %vm3104_vm7, %v983_v45, %v984_v39  ;;  %v990_v8 = vrot.slane %v988_v48, 4  ;;  %v995_v4 = vrot.slane %v3066_v42, 5  ;;  %v989_v13 = vsel %vm3104_vm7, %v2296_v40, %v988_v48 }
  0x49   : > { %2561 = vmatmul.mubr.msk.bf16.vlgmr.msra.gmra.mxu1 %vm643_vm3, %v3186_v36  ;;  %v2297_v5 = vrot.slane %v3059_v35, 9  ;;  %v1293_v56 = vshrl.u32 %v3215_v49, 16  ;;  %v1296_v59 = vshll.u32 %v3215_v49, 16  ;;  %v1306_v60 = vshrl.u32 %v3232_v54, 16 }
  0x4a   : > { %2595 = vmatpush3.bf16.msra.mxu1 %v1177_v62  ;;  %2564 = vmatprep.mubr.msk.bf16.mxu1 %vm643_vm3, %v3209_v15  ;;  %v992_v61 = vsel %vm3104_vm7, %v990_v8, %v991_v47  ;;  %v1302_v34 = vshll.u32 %v3232_v54, 16  ;;  %v1312_v6 = vshll.u32 %v417_v51, 16  ;;  %v3260_v58 = vcombine.low %v982_v19, %v985_v63 }
  0x4b   : > { %v998_v1 = vrot.slane %v3080_v53, 5  ;;  %2710 = vmatprep.subr.msk.bf16.mxu1 %vm668_vm0, %v3242_v11  ;;  %v1295_v10 = vrot.slane %v1293_v56, 4  ;;  %v1298_v12 = vrot.slane %v1296_v59, 5  ;;  %v3265_v16 = vcombine.low %v989_v13, %v992_v61 }
  0x4c   : > { %v997_v18 = vrot.slane %v995_v4, 4  ;;  %v1304_v14 = vrot.slane %v1302_v34, 5  ;;  %v1308_v20 = vrot.slane %v1306_v60, 4  ;;  %v2335_v53 = vrot.slane %v3215_v49, 9 }
  0x4d   : > { %2583 = vmatmul.mubr.msk.bf16.gmra.mxu0 %vm643_vm3, %v3222_v17  ;;  %v1299_v22 = vor.u32 %v1298_v12, %v1295_v10  ;;  %v1443_v26 = vrot.slane %v3232_v54, 5  ;;  %v1446_v27 = vrot.slane %v417_v51, 5  ;;  %v1314_v38 = vrot.slane %v1312_v6, 5 }
  0x4e   : > { %2586 = vmatprep.mubr.msk.bf16.mxu0 %vm643_vm3, %v3234_v55  ;;  %v1309_v37 = vor.u32 %v1308_v20, %v1304_v14  ;;  %v1699_v39 = vshrl.u32 %v3269_v25, 16  ;;  %v1702_v28 = vshll.u32 %v3269_v25, 16  ;;  %v1712_v48 = vshrl.u32 %v3275_v31, 16 }
  0x4f   : > { %v1300_v45 = vrot.slane %v1299_v22, 4  ;;  %v1444_v40 = vsel %vm3104_vm7, %v2335_v53, %v1443_v26  ;;  %v1445_v62 = vrot.slane %v1443_v26, 4  ;;  %v1708_v63 = vshll.u32 %v3275_v31, 16 }
  0x50   : > { %v1310_v47 = vrot.slane %v1309_v37, 4  ;;  %v1701_v19 = vrot.slane %v1699_v39, 4  ;;  %v1704_v51 = vrot.slane %v1702_v28, 5  ;;  %v1714_v56 = vrot.slane %v1712_v48, 4 }
  0x51   : > { %2565 = vmatmul.mubr.msk.bf16.gmra.mxu1 %vm643_vm3, %v3220_v50  ;;  %v1305_v8 = vsel %vm2936_vm4, %v1300_v45, %v1304_v14  ;;  %v1447_v13 = vsel %vm3104_vm7, %v1445_v62, %v1446_v27  ;;  %v1718_v59 = vshll.u32 %v420_v29, 16  ;;  %v1710_v6 = vrot.slane %v1708_v63, 5 }
  0x52   : > { %2568 = vmatprep.mubr.msk.bf16.mxu1 %vm643_vm3, %v3226_v3  ;;  %v1315_v61 = vsel %vm2936_vm4, %v1310_v47, %v1314_v38  ;;  %v3295_v60 = vcombine.low %v1444_v40, %v1447_v13  ;;  %v1705_v34 = vor.u32 %v1704_v51, %v1701_v19  ;;  %v2366_v12 = vrot.slane %v3269_v25, 9 }
  0x53   : > { %v3297_v10 = vcombine.low %v1305_v8, %v1315_v61  ;;  %v1849_v14 = vrot.slane %v3275_v31, 5  ;;  %v1715_v22 = vor.u32 %v1714_v56, %v1710_v6  ;;  %v1720_v53 = vrot.slane %v1718_v59, 5 }
  0x54   : > { %v1706_v20 = vrot.slane %v1705_v34, 4  ;;  %v1852_v26 = vrot.slane %v420_v29, 5  ;;  %v2279_v27 = vcombine.low %v2955_v52, %v2959_v57  ;;  %v2280_v37 = vcombine.low %v2996_v32, %v3009_v44 }
  0x55   : > { %2587 = vmatmul.mubr.msk.bf16.gmra.mxu0 %vm643_vm3, %v3260_v58  ;;  %v3309_v38 = vsel %vm3104_vm7, %v2366_v12, %v1849_v14  ;;  %v1851_v39 = vrot.slane %v1849_v14, 4  ;;  %v996_v52 = vsel %vm3104_vm7, %v2297_v5, %v995_v4  ;;  %v999_v57 = vsel %vm3104_vm7, %v997_v18, %v998_v1 }
  0x56   : > { %2590 = vmatprep.mubr.msk.bf16.mxu0 %vm643_vm3, %v3265_v16  ;;  %v1711_v32 = vsel %vm2936_vm4, %v1706_v20, %v1710_v6  ;;  %v1716_v44 = vrot.slane %v1715_v22, 4  ;;  %v2306_v4 = vcombine.low %v996_v52, %v999_v57  ;;  %v2281_v1 = vcombine.low %v3059_v35, %v3066_v42  ;;  %v2356_v35 = vld [vmem:[%s3709_s3 + $0xe] sm:$0x3] }
  0x57   : > { %v3325_v28 = vsel %vm3104_vm7, %v1851_v39, %v1852_v26  ;;  %v1583_v30 = vsel %vm668_vm0, %v3196_v41, 0  ;;  %v2316_v42 = vcombine.low %v3215_v49, %v3232_v54  ;;  %v1731_v41 = vsel %vm668_vm0, %v2356_v35, 0 }
  0x58   : > { %v1721_v29 = vsel %vm2936_vm4, %v1716_v44, %v1720_v53  ;;  %v2368_v45 = vcombine.low %v3309_v38, %v3325_v28 }
  0x59   : > { %2569 = vmatmul.mubr.msk.bf16.gmra.mxu1 %vm643_vm3, %v2279_v27  ;;  %v3332_v5 = vcombine.low %v1711_v32, %v1721_v29 }
  0x5a   : > { %2572 = vmatprep.mubr.msk.bf16.mxu1 %vm643_vm3, %v2280_v37 }
  0x5d   : > { %2591 = vmatmul.mubr.msk.bf16.gmra.mxu0 %vm643_vm3, %v2306_v4 }
  0x5e   : > { %2614 = vmatprep.mubr.msk.bf16.mxu0 %vm643_vm3, %v2998_v33  ;;  %v1457_v33 = vsel %vm668_vm0, %v3242_v11, 0 }
  0x61   : > { %2573 = vmatmul.mubr.msk.bf16.gmra.mxu1 %vm643_vm3, %v2281_v1 }
  0x62   : > { %2596 = vmatprep.mubr.msk.bf16.mxu1 %vm643_vm3, %v3186_v36  ;;  %v1863_v36 = vsel %vm668_vm0, %v2367_v24, 0 }
  0x65   : > { %2615 = vmatmul.mubr.msk.bf16.vlgmr.msra.gmra.mxu0 %vm643_vm3, %v3068_v43 }
  0x66   : > { %2649 = vmatpush3.bf16.msra.mxu0 %v1583_v30  ;;  %2618 = vmatprep.mubr.msk.bf16.mxu0 %vm643_vm3, %v3119_v46 }
  0x67   : > { %2713 = vmatprep.subr.msk.bf16.mxu0 %vm668_vm0, %v2367_v24 }
  0x69   : > { %2597 = vmatmul.mubr.msk.bf16.vlgmr.msra.gmra.mxu1 %vm643_vm3, %v3209_v15 }
  0x6a   : > { %2631 = vmatpush3.bf16.msra.mxu1 %v1457_v33  ;;  %2600 = vmatprep.mubr.msk.bf16.mxu1 %vm643_vm3, %v3220_v50 }
  0x6b   : > { %2712 = vmatprep.subr.msk.bf16.mxu1 %vm668_vm0, %v2356_v35 }
  0x6d   : > { %2619 = vmatmul.mubr.msk.bf16.gmra.mxu0 %vm643_vm3, %v2975_v7 }
  0x6e   : > { %2622 = vmatprep.mubr.msk.bf16.mxu0 %vm643_vm3, %v3034_v9 }
  0x71   : > { %2601 = vmatmul.mubr.msk.bf16.gmra.mxu1 %vm643_vm3, %v3226_v3 }
  0x72   : > { %2604 = vmatprep.mubr.msk.bf16.mxu1 %vm643_vm3, %v2279_v27 }
  0x75   : > { %2623 = vmatmul.mubr.msk.bf16.gmra.mxu0 %vm643_vm3, %v3093_v2 }
  0x76   : > { %2626 = vmatprep.mubr.msk.bf16.mxu0 %vm643_vm3, %v3153_v0 }
  0x79   : > { %2605 = vmatmul.mubr.msk.bf16.gmra.mxu1 %vm643_vm3, %v2280_v37 }
  0x7a   : > { %2608 = vmatprep.mubr.msk.bf16.mxu1 %vm643_vm3, %v2281_v1 }
  0x7d   : > { %2627 = vmatmul.mubr.msk.bf16.gmra.mxu0 %vm643_vm3, %v3297_v10 }
  0x7e   : > { %2650 = vmatprep.mubr.msk.bf16.mxu0 %vm643_vm3, %v3209_v15 }
  0x81   : > { %2609 = vmatmul.mubr.msk.bf16.gmra.mxu1 %vm643_vm3, %v2316_v42 }
  0x82   : > { %2632 = vmatprep.mubr.msk.bf16.mxu1 %vm643_vm3, %v3165_v23  ;;  %v2347_v23 = vcombine.low %v3269_v25, %v3275_v31 }
  0x85   : > { %2651 = vmatmul.mubr.msk.bf16.vlgmr.msra.gmra.mxu0 %vm643_vm3, %v3220_v50 }
  0x86   : > { %2685 = vmatpush3.bf16.msra.mxu0 %v1863_v36  ;;  %2654 = vmatprep.mubr.msk.bf16.mxu0 %vm643_vm3, %v3226_v3 }
  0x89   : > { %2633 = vmatmul.mubr.msk.bf16.vlgmr.msra.gmra.mxu1 %vm643_vm3, %v3172_v21 }
  0x8a   : > { %2667 = vmatpush3.bf16.msra.mxu1 %v1731_v41  ;;  %2636 = vmatprep.mubr.msk.bf16.mxu1 %vm643_vm3, %v3222_v17 }
  0x8d   : > { %2655 = vmatmul.mubr.msk.bf16.gmra.mxu0 %vm643_vm3, %v2279_v27 }
  0x8e   : > { %2658 = vmatprep.mubr.msk.bf16.mxu0 %vm643_vm3, %v2280_v37 }
  0x91   : > { %2637 = vmatmul.mubr.msk.bf16.gmra.mxu1 %vm643_vm3, %v3234_v55 }
  0x92   : > { %2640 = vmatprep.mubr.msk.bf16.mxu1 %vm643_vm3, %v3260_v58 }
  0x95   : > { %2659 = vmatmul.mubr.msk.bf16.gmra.mxu0 %vm643_vm3, %v2281_v1 }
  0x96   : > { %2662 = vmatprep.mubr.msk.bf16.mxu0 %vm643_vm3, %v2316_v42 }
  0x99   : > { %2641 = vmatmul.mubr.msk.bf16.gmra.mxu1 %vm643_vm3, %v3265_v16 }
  0x9a   : > { %2644 = vmatprep.mubr.msk.bf16.mxu1 %vm643_vm3, %v2306_v4 }
  0x9d   : > { %2663 = vmatmul.mubr.msk.bf16.gmra.mxu0 %vm643_vm3, %v2347_v23 }
  0x9e   : > { %2686 = vmatprep.mubr.msk.bf16.mxu0 %vm643_vm3, %v3172_v21 }
  0xa1   : > { %2645 = vmatmul.mubr.msk.bf16.gmra.mxu1 %vm643_vm3, %v3295_v60 }
  0xa2   : > { %2668 = vmatprep.mubr.msk.bf16.mxu1 %vm643_vm3, %v3068_v43 }
  0xa5   : > { %2687 = vmatmul.mubr.msk.bf16.vlgmr.msra.gmra.mxu0 %vm643_vm3, %v3222_v17 }
  0xa6   : > { %2690 = vmatprep.mubr.msk.bf16.mxu0 %vm643_vm3, %v3234_v55 }
  0xa9   : > { %2669 = vmatmul.mubr.msk.bf16.vlgmr.msra.gmra.mxu1 %vm643_vm3, %v3119_v46 }
  0xaa   : > { %2672 = vmatprep.mubr.msk.bf16.mxu1 %vm643_vm3, %v2975_v7 }
  0xad   : > { %2691 = vmatmul.mubr.msk.bf16.gmra.mxu0 %vm643_vm3, %v3260_v58 }
  0xae   : > { %2694 = vmatprep.mubr.msk.bf16.mxu0 %vm643_vm3, %v3265_v16 }
  0xb1   : > { %2673 = vmatmul.mubr.msk.bf16.gmra.mxu1 %vm643_vm3, %v3034_v9 }
  0xb2   : > { %2676 = vmatprep.mubr.msk.bf16.mxu1 %vm643_vm3, %v3093_v2 }
  0xb5   : > { %2695 = vmatmul.mubr.msk.bf16.gmra.mxu0 %vm643_vm3, %v2306_v4 }
  0xb6   : > { %2698 = vmatprep.mubr.msk.bf16.mxu0 %vm643_vm3, %v3295_v60 }
  0xb9   : > { %2677 = vmatmul.mubr.msk.bf16.gmra.mxu1 %vm643_vm3, %v3153_v0 }
  0xba   : > { %2680 = vmatprep.mubr.msk.bf16.mxu1 %vm643_vm3, %v3297_v10 }
  0xbd   : > { %2699 = vmatmul.mubr.msk.bf16.gmra.mxu0 %vm643_vm3, %v2368_v45 }
  0xc1   : > { %2681 = vmatmul.mubr.msk.bf16.gmra.mxu1 %vm643_vm3, %v3332_v5 }
  0xec   : > { %v2544_v7 = vpop.f32.mrf.mxu0 }
  0xee   : > { %v706_v43 = vpop.f32.mrf.mxu0 }
  0xf0   : > { %v2545_v46 = vpop.f32.mrf.mxu0 }
  0xf1   : > { %v2552_v9 = vpop.f32.mrf.mxu1 }
  0xf2   : > { %v709_v15 = vpop.f32.mrf.mxu0 }
  0xf3   : > { %v738_v2 = vpop.f32.mrf.mxu1 }
  0xf5   : > { %v2553_v21 = vpop.f32.mrf.mxu1 }
  0xf7   : > { %v741_v49 = vpop.f32.mrf.mxu1 }
  0xfd   : > { %v2548_v0 = vpop.f32.mrf.mxu0 }
  0xff   : > { %v722_v50 = vpop.f32.mrf.mxu0 }
 0x101   : > { %v2556_v17 = vpop.f32.mrf.mxu1  ;;  %v2549_v3 = vpop.f32.mrf.mxu0 }
 0x103   : > { %v754_v54 = vpop.f32.mrf.mxu1  ;;  %v725_v55 = vpop.f32.mrf.mxu0 }
 0x105   : > { %v2557_v11 = vpop.f32.mrf.mxu1  ;;  %v2580_v58 = vpop.f32.mrf.mxu0 }
 0x107   : > { %v3444_v16 = vpop.f32.mrf.mxu1  ;;  %v1087_v18 = vpop.f32.mrf.mxu0 }
 0x109   : > { %v2562_v25 = vpop.f32.mrf.mxu1  ;;  %v2581_v31 = vpop.f32.mrf.mxu0 }
 0x10a   : > { %v879_v40 = vadd.f32 %v2562_v25, %v2544_v7 }
 0x10b   : > { %v870_v62 = vpop.f32.mrf.mxu1  ;;  %v1090_v48 = vpop.f32.mrf.mxu0 }
 0x10c   : > { %v3446_v47 = vadd.f32 %v2580_v58, %v879_v40  ;;  %v871_v19 = vadd.f32 %v870_v62, %v706_v43 }
 0x10d   : > { %v2563_v51 = vpop.f32.mrf.mxu1  ;;  %v2584_v63 = vpop.f32.mrf.mxu0 }
 0x10e   : > { %v3448_v8 = vadd.f32 %v1087_v18, %v871_v19  ;;  %v882_v13 = vadd.f32 %v2563_v51, %v2545_v46 }
 0x10f   : > { %v873_v56 = vpop.f32.mrf.mxu1  ;;  %v1103_v59 = vpop.f32.mrf.mxu0 }
 0x110   : > { %v3450_v61 = vadd.f32 %v2581_v31, %v882_v13  ;;  %v874_v60 = vadd.f32 %v873_v56, %v709_v15 }
 0x111   : > { %v2566_v34 = vpop.f32.mrf.mxu1  ;;  %v2585_v6 = vpop.f32.mrf.mxu0 }
 0x112   : > { %v3452_v10 = vadd.f32 %v1090_v48, %v874_v60  ;;  %v895_v12 = vadd.f32 %v2566_v34, %v2548_v0 }
 0x113   : > { %v886_v14 = vpop.f32.mrf.mxu1  ;;  %v1106_v20 = vpop.f32.mrf.mxu0 }
 0x114   : > { %v3454_v22 = vadd.f32 %v2584_v63, %v895_v12  ;;  %v887_v53 = vadd.f32 %v886_v14, %v722_v50 }
 0x115   : > { %v2567_v26 = vpop.f32.mrf.mxu1  ;;  %v2588_v27 = vpop.f32.mrf.mxu0 }
 0x116   : > { %v3456_v37 = vadd.f32 %v1103_v59, %v887_v53  ;;  %v898_v38 = vadd.f32 %v2567_v26, %v2549_v3 }
 0x117   : > { %v889_v39 = vpop.f32.mrf.mxu1  ;;  %v1119_v52 = vpop.f32.mrf.mxu0 }
 0x118   : > { %v3458_v57 = vadd.f32 %v2585_v6, %v898_v38  ;;  %v890_v32 = vadd.f32 %v889_v39, %v725_v55 }
 0x119   : > { %v2570_v44 = vpop.f32.mrf.mxu1  ;;  %v2589_v28 = vpop.f32.mrf.mxu0 }
 0x11a   : > { %v3460_v29 = vadd.f32 %v1106_v20, %v890_v32  ;;  %v911_v45 = vadd.f32 %v2570_v44, %v2552_v9 }
 0x11b   : > { %v902_v4 = vpop.f32.mrf.mxu1  ;;  %v1122_v5 = vpop.f32.mrf.mxu0 }
 0x11c   : > { %v3462_v1 = vadd.f32 %v2588_v27, %v911_v45  ;;  %v903_v30 = vadd.f32 %v902_v4, %v738_v2 }
 0x11d   : > { %v2571_v24 = vpop.f32.mrf.mxu1  ;;  %v2592_v33 = vpop.f32.mrf.mxu0 }
 0x11e   : > { %v3464_v35 = vadd.f32 %v1119_v52, %v903_v30  ;;  %v914_v42 = vadd.f32 %v2571_v24, %v2553_v21 }
 0x11f   : > { %v905_v36 = vpop.f32.mrf.mxu1  ;;  %v1135_v41 = vpop.f32.mrf.mxu0 }
 0x120   : > { %v3466_v23 = vadd.f32 %v2589_v28, %v914_v42  ;;  %v906_v7 = vadd.f32 %v905_v36, %v741_v49 }
 0x121   : > { %v2574_v43 = vpop.f32.mrf.mxu1  ;;  %v2593_v46 = vpop.f32.mrf.mxu0 }
 0x122   : > { %v3468_v15 = vadd.f32 %v1122_v5, %v906_v7  ;;  %v927_v9 = vadd.f32 %v2574_v43, %v2556_v17 }
 0x123   : > { %v918_v0 = vpop.f32.mrf.mxu1  ;;  %v1138_v50 = vpop.f32.mrf.mxu0 }
 0x124   : > { %v3470_v3 = vadd.f32 %v2592_v33, %v927_v9  ;;  %v919_v2 = vadd.f32 %v918_v0, %v754_v54 }
 0x125   : > { %v2575_v55 = vpop.f32.mrf.mxu1  ;;  %v3472_v58 = vpop.f32.mrf.mxu0 }
 0x126   : > { %v3474_v18 = vadd.f32 %v1135_v41, %v919_v2  ;;  %v930_v21 = vadd.f32 %v2575_v55, %v2557_v11 }
 0x127   : > { %v921_v25 = vpop.f32.mrf.mxu1  ;;  %v3476_v31 = vpop.f32.mrf.mxu0 }
 0x128   : > { %3718 = vst [vmem:[#allocation2_spill] sm:$0xff] %v3474_v18  ;;  %v3478_v49 = vadd.f32 %v2593_v46, %v930_v21  ;;  %v922_v40 = vadd.f32 %v921_v25, %v3444_v16 }
 0x129   : > { %v2598_v62 = vpop.f32.mrf.mxu1  ;;  %v3481_v17 = vpop.f32.mrf.mxu0 }
 0x12a   : > { %3719 = vst [vmem:[#allocation3_spill] sm:$0xff] %v3478_v49  ;;  %v3483_v48 = vadd.f32 %v1138_v50, %v922_v40 }
 0x12b   : > { %v1213_v19 = vpop.f32.mrf.mxu1  ;;  %v3485_v54 = vpop.f32.mrf.mxu0 }
 0x12c   : > { %3720 = vst [vmem:[#allocation4_spill] sm:$0xff] %v3483_v48 }
 0x12d   : > { %v2599_v51 = vpop.f32.mrf.mxu1  ;;  %v3487_v63 = vpop.f32.mrf.mxu0 }
 0x12f   : > { %v1216_v13 = vpop.f32.mrf.mxu1  ;;  %v3489_v11 = vpop.f32.mrf.mxu0 }
 0x131   : > { %v3491_v56 = vpop.f32.mrf.mxu1  ;;  %v3493_v59 = vpop.f32.mrf.mxu0 }
 0x133   : > { %v3495_v60 = vpop.f32.mrf.mxu1  ;;  %v3497_v16 = vpop.f32.mrf.mxu0 }
 0x135   : > { %v3499_v34 = vpop.f32.mrf.mxu1  ;;  %v3501_v6 = vpop.f32.mrf.mxu0 }
 0x137   : > { %v3503_v12 = vpop.f32.mrf.mxu1  ;;  %v3505_v14 = vpop.f32.mrf.mxu0 }
 0x139   : > { %v3507_v20 = vpop.f32.mrf.mxu1  ;;  %v3509_v53 = vpop.f32.mrf.mxu0 }
 0x13b   : > { %v3511_v26 = vpop.f32.mrf.mxu1  ;;  %v3513_v27 = vpop.f32.mrf.mxu0 }
 0x13c   : > { %3721 = vst [vmem:[#allocation5_spill] sm:$0xff] %v3513_v27 }
 0x13d   : > { %v3515_v38 = vpop.f32.mrf.mxu1  ;;  %v3517_v39 = vpop.f32.mrf.mxu0 }
 0x13e   : > { %3722 = vst [vmem:[#allocation6_spill] sm:$0xff] %v3517_v39 }
 0x13f   : > { %v3519_v52 = vpop.f32.mrf.mxu1  ;;  %v3521_v32 = vpop.f32.mrf.mxu0 }
 0x140   : > { %3723 = vst [vmem:[#allocation7_spill] sm:$0xff] %v3521_v32 }
 0x141   : > { %v3523_v44 = vpop.f32.mrf.mxu1  ;;  %v3525_v28 = vpop.f32.mrf.mxu0 }
 0x142   : > { %3724 = vst [vmem:[#allocation8_spill] sm:$0xff] %v3525_v28 }
 0x143   : > { %v3527_v45 = vpop.f32.mrf.mxu1  ;;  %v3529_v4 = vpop.f32.mrf.mxu0 }
 0x144   : > { %3725 = vst [vmem:[#allocation9_spill] sm:$0xff] %v3527_v45  ;;  %3726 = vst [vmem:[#allocation10_spill] sm:$0xff] %v3529_v4  ;;  %v1278_v45 = vadd.f32 %v2598_v62, %v3446_v47  ;;  %v1277_v62 = vadd.f32 %v1216_v13, %v3452_v10 }
 0x145   : > { %v3531_v5 = vpop.f32.mrf.mxu1  ;;  %v2652_v30 = vpop.f32.mrf.mxu0 }
 0x146   : > { %3727 = vst [vmem:[#allocation11_spill] sm:$0xff] %v3531_v5 }
 0x147   : > { %v3533_v24 = vpop.f32.mrf.mxu1  ;;  %v1619_v33 = vpop.f32.mrf.mxu0 }
 0x148   : > { %3728 = vst [vmem:[#allocation12_spill] sm:$0xff] %v3533_v24 }
 0x149   : > { %v2634_v42 = vpop.f32.mrf.mxu1  ;;  %v2653_v36 = vpop.f32.mrf.mxu0 }
 0x14b   : > { %v1493_v41 = vpop.f32.mrf.mxu1  ;;  %v3535_v7 = vpop.f32.mrf.mxu0 }
 0x14d   : > { %v2635_v43 = vpop.f32.mrf.mxu1  ;;  %v3537_v46 = vpop.f32.mrf.mxu0 }
 0x14f   : > { %v1496_v9 = vpop.f32.mrf.mxu1  ;;  %v3539_v0 = vpop.f32.mrf.mxu0 }
 0x151   : > { %v2638_v50 = vpop.f32.mrf.mxu1  ;;  %v3541_v2 = vpop.f32.mrf.mxu0 }
 0x153   : > { %v1509_v55 = vpop.f32.mrf.mxu1  ;;  %v3543_v21 = vpop.f32.mrf.mxu0 }
 0x154   : > { %3729 = vst [vmem:[#allocation13_spill] sm:$0xff] %v3543_v21 }
 0x155   : > { %v3545_v25 = vpop.f32.mrf.mxu1  ;;  %v3547_v40 = vpop.f32.mrf.mxu0 }
 0x156   : > { %3730 = vst [vmem:[#allocation14_spill] sm:$0xff] %v3547_v40 }
 0x157   : > { %v3549_v4 = vpop.f32.mrf.mxu1  ;;  %v3551_v28 = vpop.f32.mrf.mxu0 }
 0x158   : > { %3731 = vst [vmem:[#allocation15_spill] sm:$0xff] %v3551_v28  ;;  %v1276_v28 = vadd.f32 %v1213_v19, %v3448_v8 }
 0x159   : > { %v3553_v32 = vpop.f32.mrf.mxu1  ;;  %v3555_v24 = vpop.f32.mrf.mxu0 }
 0x15a   : > { %3732 = vst [vmem:[#allocation16_spill] sm:$0xff] %v3555_v24  ;;  %v1424_v47 = vadd.f32 %v3476_v31, %v1276_v28  ;;  %v1425_v31 = vadd.f32 %v3485_v54, %v1277_v62  ;;  %v1286_v54 = vadd.f32 %v3507_v20, %v3462_v1 }
 0x15b   : > { %v3557_v48 = vpop.f32.mrf.mxu1  ;;  %v3559_v5 = vpop.f32.mrf.mxu0 }
 0x15c   : > { %3733 = vst [vmem:[#allocation17_spill] sm:$0xff] %v3557_v48  ;;  %3734 = vst [vmem:[#allocation18_spill] sm:$0xff] %v3559_v5  ;;  %v1426_v48 = vadd.f32 %v3472_v58, %v1278_v45  ;;  %v1279_v5 = vadd.f32 %v2599_v51, %v3450_v61  ;;  %v1282_v58 = vadd.f32 %v3491_v56, %v3454_v22 }
 0x15d   : > { %v3561_v49 = vpop.f32.mrf.mxu1  ;;  %v3563_v39 = vpop.f32.mrf.mxu0  ;;  %v1556_v61 = vadd.f32 %v1493_v41, %v1424_v47  ;;  %v1280_v51 = vadd.f32 %v3495_v60, %v3456_v37  ;;  %v1557_v56 = vadd.f32 %v1496_v9, %v1425_v31  ;;  %v1283_v60 = vadd.f32 %v3499_v34, %v3458_v57  ;;  %v3612_v57 = vld [vmem:[%s3710_s4] ss:$0 sm:$0xff] }
 0x15e   : > { %3735 = vst [vmem:[#allocation19_spill] sm:$0xff] %v3561_v49 }
 0x15f   : > { %v3566_v40 = vpop.f32.mrf.mxu1  ;;  %v3568_v18 = vpop.f32.mrf.mxu0  ;;  %v1682_v22 = vadd.f32 %v1619_v33, %v1556_v61  ;;  %v1428_v37 = vadd.f32 %v3489_v11, %v1280_v51  ;;  %v1284_v11 = vadd.f32 %v3511_v26, %v3464_v35  ;;  %v1683_v1 = vadd.f32 %v3535_v7, %v1557_v56  ;;  %v3739_v56 = vld [vmem:[#allocation13_spill] sm:$0xff] }
 0x160   : > { %3736 = vst [vmem:[#allocation20_spill] sm:$0xff] %v3568_v18  ;;  %v1558_v18 = vadd.f32 %v2634_v42, %v1426_v48  ;;  %v1287_v35 = vadd.f32 %v3515_v38, %v3466_v23 }
 0x161   : > { %v3571_v27 = vpop.f32.mrf.mxu1  ;;  %v3573_v24 = vpop.f32.mrf.mxu0  ;;  %v1560_v33 = vadd.f32 %v1509_v55, %v1428_v37 }
 0x162   : > { %3737 = vst [vmem:[#allocation21_spill] sm:$0xff] %v3573_v24  ;;  %v1427_v24 = vadd.f32 %v3481_v17, %v1279_v5  ;;  %v1684_v10 = vadd.f32 %v2652_v30, %v1558_v18  ;;  %v1430_v17 = vadd.f32 %v3487_v63, %v1282_v58  ;;  %v1281_v18 = vadd.f32 %v3503_v12, %v3460_v29 }
 0x163   : > { %v3577_v21 = vpop.f32.mrf.mxu1  ;;  %v3579_v49 = vpop.f32.mrf.mxu0  ;;  %v1435_v31 = vadd.f32 %v3509_v53, %v1287_v35  ;;  %v3740_v53 = vld [vmem:[#allocation17_spill] sm:$0xff] }
 0x164   : > { %3738 = vst [vmem:[#allocation22_spill] sm:$0xff] %v3579_v49  ;;  %v1559_v48 = vadd.f32 %v2635_v43, %v1427_v24  ;;  %v1562_v41 = vadd.f32 %v2638_v50, %v1430_v17  ;;  %v1429_v9 = vadd.f32 %v3497_v16, %v1281_v18  ;;  %v1434_v50 = vadd.f32 %v3501_v6, %v1286_v54  ;;  %v3741_v54 = vld [vmem:[#allocation5_spill] sm:$0xff] }
 0x165   : > { %v3584_v8 = vpop.f32.mrf.mxu1  ;;  %v2688_v19 = vpop.f32.mrf.mxu0  ;;  %v1686_v16 = vadd.f32 %v3539_v0, %v1560_v33  ;;  %v1290_v0 = vadd.f32 %v3523_v44, %v3470_v3 }
 0x166   : > { %v1685_v42 = vadd.f32 %v2653_v36, %v1559_v48  ;;  %v1431_v36 = vadd.f32 %v3493_v59, %v1283_v60  ;;  %v1688_v47 = vadd.f32 %v3537_v46, %v1562_v41  ;;  %v1432_v59 = vadd.f32 %v3505_v14, %v1284_v11  ;;  %v3744_v41 = vld [vmem:[#allocation19_spill] sm:$0xff] }
 0x167   : > { %v3591_v45 = vpop.f32.mrf.mxu1  ;;  %v1899_v49 = vpop.f32.mrf.mxu0  ;;  %v1285_v14 = vadd.f32 %v3519_v52, %v3468_v15 }
 0x168   : > { %v1563_v6 = vadd.f32 %v3545_v25, %v1431_v36  ;;  %v1566_v25 = vadd.f32 %v3553_v32, %v1434_v50  ;;  %v1564_v37 = vadd.f32 %v3740_v53, %v1432_v59  ;;  %v3748_v50 = vld [vmem:[#allocation11_spill] sm:$0xff] }
 0x169   : > { %v2670_v13 = vpop.f32.mrf.mxu1  ;;  %v2689_v28 = vpop.f32.mrf.mxu0 }
 0x16a   : > { %v1832_v5 = vadd.f32 %v2670_v13, %v1684_v10 }
 0x16b   : > { %v1767_v30 = vpop.f32.mrf.mxu1  ;;  %v1902_v24 = vpop.f32.mrf.mxu0 }
 0x16c   : > { %v1964_v43 = vadd.f32 %v2688_v19, %v1832_v5  ;;  %v1830_v63 = vadd.f32 %v1767_v30, %v1682_v22  ;;  %v1561_v19 = vadd.f32 %v3549_v4, %v1429_v9  ;;  %v1689_v22 = vadd.f32 %v3541_v2, %v1563_v6  ;;  %v3742_v2 = vld [vmem:[#allocation2_spill] sm:$0xff]  ;;  %v3747_v9 = vld [vmem:[#allocation3_spill] sm:$0xff] }
 0x16d   : > { %v2671_v29 = vpop.f32.mrf.mxu1  ;;  %v2692_v34 = vpop.f32.mrf.mxu0  ;;  %v1433_v30 = vadd.f32 %v3741_v54, %v1285_v14  ;;  %v1291_v35 = vadd.f32 %v3748_v50, %v3747_v9 }
 0x16e   : > { %v1962_v12 = vadd.f32 %v1899_v49, %v1830_v63  ;;  %v1833_v20 = vadd.f32 %v2671_v29, %v1685_v42  ;;  %v1987_v7 = vadd.f32 %v3612_v57, %v1964_v43  ;;  %v1687_v5 = vadd.f32 %v3739_v56, %v1561_v19  ;;  %v3745_v29 = vld [vmem:[#allocation6_spill] sm:$0xff] }
 0x16f   : > { %v1770_v26 = vpop.f32.mrf.mxu1  ;;  %v1915_v55 = vpop.f32.mrf.mxu0  ;;  %v1567_v43 = vadd.f32 %v3744_v41, %v1435_v31  ;;  %v1565_v14 = vadd.f32 %v3566_v40, %v1433_v30 }
 0x170   : > { %v1965_v49 = vadd.f32 %v2689_v28, %v1833_v20  ;;  %v1831_v62 = vadd.f32 %v1770_v26, %v1683_v1  ;;  %v1985_v58 = vadd.f32 %v3612_v57, %v1962_v12  ;;  %v2003_v48 = vmax.f32 %v1987_v7, 0.0  ;;  %v3749_v26 = vld [vmem:[#allocation4_spill] sm:$0xff] }
 0x171   : > { %v2674_v23 = vpop.f32.mrf.mxu1  ;;  %v2693_v38 = vpop.f32.mrf.mxu0  ;;  %v1438_v1 = vadd.f32 %v3745_v29, %v1290_v0 }
 0x172   : > { %v1988_v61 = vadd.f32 %v3612_v57, %v1965_v49  ;;  %v1963_v46 = vadd.f32 %v1902_v24, %v1831_v62  ;;  %v1836_v51 = vadd.f32 %v2674_v23, %v1688_v47  ;;  %v2001_v32 = vmax.f32 %v1985_v58, 0.0  ;;  %v3743_v24 = vld [vmem:[#allocation9_spill] sm:$0xff] }
 0x173   : > { %v1783_v4 = vpop.f32.mrf.mxu1  ;;  %v1918_v10 = vpop.f32.mrf.mxu0  ;;  %v1288_v42 = vadd.f32 %v3743_v24, %v3742_v2 }
 0x174   : > { %v2004_v13 = vmax.f32 %v1988_v61, 0.0  ;;  %v1986_v28 = vadd.f32 %v3612_v57, %v1963_v46  ;;  %v1834_v17 = vadd.f32 %v1783_v4, %v1686_v16  ;;  %v1968_v15 = vadd.f32 %v2692_v34, %v1836_v51  ;;  %v3746_v34 = vld [vmem:[#allocation14_spill] sm:$0xff]  ;;  %v3751_v16 = vld [vmem:[#allocation15_spill] sm:$0xff]  ;;  %v3753_v51 = vld [vmem:[#allocation16_spill] sm:$0xff] }
 0x175   : > { %v2675_v3 = vpop.f32.mrf.mxu1  ;;  %v2696_v52 = vpop.f32.mrf.mxu0  ;;  %v1692_v12 = vadd.f32 %v3746_v34, %v1566_v25  ;;  %v1690_v6 = vadd.f32 %v3751_v16, %v1564_v37  ;;  %v3752_v61 = vld [vmem:[#allocation7_spill] sm:$0xff]  ;;  %v1693_v31 = vadd.f32 %v3753_v51, %v1567_v43 }
 0x176   : > { %v2420_v44 = vpack.c.bf16 %v2004_v13, %v2003_v48  ;;  %v2002_v60 = vmax.f32 %v1986_v28, 0.0  ;;  %v1966_v18 = vadd.f32 %v1915_v55, %v1834_v17  ;;  %v1837_v63 = vadd.f32 %v2675_v3, %v1689_v22  ;;  %v3750_v55 = vld [vmem:[#allocation12_spill] sm:$0xff] }
 0x177   : > { %v1786_v11 = vpop.f32.mrf.mxu1  ;;  %v1931_v33 = vpop.f32.mrf.mxu0  ;;  %v1289_v47 = vadd.f32 %v3750_v55, %v3749_v26  ;;  %v1991_v7 = vadd.f32 %v3612_v57, %v1968_v15  ;;  %v1436_v46 = vadd.f32 %v3752_v61, %v1288_v42  ;;  %v3754_v17 = vld [vmem:[#allocation8_spill] sm:$0xff] }
 0x178   : > { %2452 = vst [vmem:[%s3644_s14 + $0x8] sm:$0xff] %v2420_v44   ;;  %v2415_v20 = vpack.c.bf16 %v2002_v60, %v2001_v32  ;;  %v1835_v36 = vadd.f32 %v1786_v11, %v1687_v5  ;;  %v1969_v49 = vadd.f32 %v2693_v38, %v1837_v63  ;;  %v1989_v19 = vadd.f32 %v3612_v57, %v1966_v18  ;;  %v3756_v60 = vld [vmem:[#allocation18_spill] sm:$0xff]  ;;  %v3757_v11 = vld [vmem:[#allocation20_spill] sm:$0xff] }
 0x179   : > { %v2678_v62 = vpop.f32.mrf.mxu1  ;;  %v2697_v59 = vpop.f32.mrf.mxu0  ;;  %v1570_v38 = vadd.f32 %v3571_v27, %v1438_v1  ;;  %v1439_v22 = vadd.f32 %v3754_v17, %v1291_v35  ;;  %v2007_v5 = vmax.f32 %v1991_v7, 0.0  ;;  %v1568_v40 = vadd.f32 %v3577_v21, %v1436_v46 }
 0x17a   : > { %2416 = vst [vmem:[%s3644_s14] sm:$0xff] %v2415_v20   ;;  %v1967_v23 = vadd.f32 %v1918_v10, %v1835_v36  ;;  %v1840_v58 = vadd.f32 %v2678_v62, %v1692_v12  ;;  %v1992_v0 = vadd.f32 %v3612_v57, %v1969_v49  ;;  %v3755_v10 = vld [vmem:[#allocation10_spill] sm:$0xff]  ;;  %v2005_v3 = vmax.f32 %v1989_v19, 0.0 }
 0x17b   : > { %v1799_v25 = vpop.f32.mrf.mxu1  ;;  %v1934_v4 = vpop.f32.mrf.mxu0  ;;  %v1437_v56 = vadd.f32 %v3755_v10, %v1289_v47  ;;  %v1691_v27 = vadd.f32 %v3756_v60, %v1565_v14  ;;  %v1696_v2 = vadd.f32 %v3563_v39, %v1570_v38  ;;  %v1694_v29 = vadd.f32 %v3757_v11, %v1568_v40 }
 0x17c   : > { %v1990_v48 = vadd.f32 %v3612_v57, %v1967_v23  ;;  %v1972_v13 = vadd.f32 %v2696_v52, %v1840_v58  ;;  %v1838_v28 = vadd.f32 %v1799_v25, %v1690_v6  ;;  %v2008_v53 = vmax.f32 %v1992_v0, 0.0 }
 0x17d   : > { %v2679_v37 = vpop.f32.mrf.mxu1  ;;  %v2700_v15 = vpop.f32.mrf.mxu0  ;;  %v1571_v52 = vadd.f32 %v3584_v8, %v1439_v22  ;;  %v1569_v1 = vadd.f32 %v3591_v45, %v1437_v56  ;;  %v3759_v45 = vld [vmem:[#allocation22_spill] sm:$0xff] }
 0x17e   : > { %v2006_v32 = vmax.f32 %v1990_v48, 0.0  ;;  %v1841_v44 = vadd.f32 %v2679_v37, %v1693_v31  ;;  %v2430_v18 = vpack.c.bf16 %v2008_v53, %v2007_v5  ;;  %v1970_v54 = vadd.f32 %v1931_v33, %v1838_v28  ;;  %v3758_v33 = vld [vmem:[#allocation21_spill] sm:$0xff] }
 0x17f   : > { %v1802_v30 = vpop.f32.mrf.mxu1  ;;  %v1995_v42 = vadd.f32 %v3612_v57, %v1972_v13  ;;  %v1947_v63 = vpop.f32.mrf.mxu0  ;;  %v1697_v12 = vadd.f32 %v3758_v33, %v1571_v52  ;;  %v1695_v49 = vadd.f32 %v3759_v45, %v1569_v1 }
 0x180   : > { %v2425_v24 = vpack.c.bf16 %v2006_v32, %v2005_v3  ;;  %v1973_v41 = vadd.f32 %v2697_v59, %v1841_v44  ;;  %2454 = vst [vmem:[%s3644_s14 + $0x18] sm:$0xff] %v2430_v18   ;;  %v1839_v43 = vadd.f32 %v1802_v30, %v1691_v27  ;;  %v1993_v39 = vadd.f32 %v3612_v57, %v1970_v54 }
 0x181   : > { %v2682_v21 = vpop.f32.mrf.mxu1  ;;  %v2011_v9 = vmax.f32 %v1995_v42, 0.0  ;;  %v2701_v7 = vpop.f32.mrf.mxu0 }
 0x182   : > { %2453 = vst [vmem:[%s3644_s14 + $0x10] sm:$0xff] %v2425_v24   ;;  %v1996_v8 = vadd.f32 %v3612_v57, %v1973_v41  ;;  %v1844_v34 = vadd.f32 %v2682_v21, %v1696_v2  ;;  %v1971_v20 = vadd.f32 %v1934_v4, %v1839_v43  ;;  %v2009_v6 = vmax.f32 %v1993_v39, 0.0 }
 0x183   : > { %v1815_v36 = vpop.f32.mrf.mxu1  ;;  %v1950_v31 = vpop.f32.mrf.mxu0 }
 0x184   : > { %v2012_v50 = vmax.f32 %v1996_v8, 0.0  ;;  %v1976_v35 = vadd.f32 %v2700_v15, %v1844_v34  ;;  %v1842_v26 = vadd.f32 %v1815_v36, %v1694_v29  ;;  %v1994_v55 = vadd.f32 %v3612_v57, %v1971_v20 }
 0x185   : > { %v2683_v47 = vpop.f32.mrf.mxu1 }
 0x186   : > { %v2440_v62 = vpack.c.bf16 %v2012_v50, %v2011_v9  ;;  %v1974_v59 = vadd.f32 %v1947_v63, %v1842_v26  ;;  %v1845_v16 = vadd.f32 %v2683_v47, %v1697_v12  ;;  %v2010_v19 = vmax.f32 %v1994_v55, 0.0 }
 0x187   : > { %v1818_v23 = vpop.f32.mrf.mxu1  ;;  %v1999_v58 = vadd.f32 %v3612_v57, %v1976_v35 }
 0x188   : > { %2456 = vst [vmem:[%s3644_s14 + $0x28] sm:$0xff] %v2440_v62   ;;  %v1977_v61 = vadd.f32 %v2701_v7, %v1845_v16  ;;  %v1843_v46 = vadd.f32 %v1818_v23, %v1695_v49  ;;  %v2435_v51 = vpack.c.bf16 %v2010_v19, %v2009_v6  ;;  %v1997_v14 = vadd.f32 %v3612_v57, %v1974_v59 }
 0x189   : > { %v2015_v4 = vmax.f32 %v1999_v58, 0.0 }
 0x18a   : > { %v2000_v0 = vadd.f32 %v3612_v57, %v1977_v61  ;;  %v1975_v25 = vadd.f32 %v1950_v31, %v1843_v46  ;;  %2455 = vst [vmem:[%s3644_s14 + $0x20] sm:$0xff] %v2435_v51   ;;  %v2013_v13 = vmax.f32 %v1997_v14, 0.0 }
 0x18c   : > { %v2016_v38 = vmax.f32 %v2000_v0, 0.0  ;;  %v1998_v48 = vadd.f32 %v3612_v57, %v1975_v25 }
 0x18e   : > { %v2450_v28 = vpack.c.bf16 %v2016_v38, %v2015_v4  ;;  %v2014_v17 = vmax.f32 %v1998_v48, 0.0 }
 0x190   : > { %2458 = vst [vmem:[%s3644_s14 + $0x38] sm:$0xff] %v2450_v28   ;;  %v2445_v22 = vpack.c.bf16 %v2014_v17, %v2013_v13 }
 0x192   : > { %2457 = vst [vmem:[%s3644_s14 + $0x30] sm:$0xff] %v2445_v22  }
 0x193 PF: > { %s15_s22 = sadd.s32 1, %s2806_s22   ;;  %s3760_s18 = smov %s2798_s20 }
 0x194   : > { %p12_p10 = scmp.ge.s32.totalorder %s15_s22, 6   ;;  %s3761_s19 = smov %s2802_s21 }
 0x195   : > { %s3762_s20 = smov %s3765_s23  ;;  %s3763_s21 = smov %s3769_s24 }
 0x196   :  { %14 = sbr.rel (!%p12_p10) target bundleno = 3 (0x3), region = 84 }

</bundles_post_ra>
